<compile_context>
chip_gen: v6e
topology: v6e:2x2x1
jax: 0.10.0
libtpu: 0.0.40
codegen_flags: <defaults>
</compile_context>

<pallas_src>
import jax
import jax.numpy as jnp
from jax.experimental import pallas as pl
from jax.experimental.pallas import tpu as pltpu

# ---- model hyper-parameters (small, consistent with the module) -------------
B, L, D = 2, 8, 32          # batch, click-sequence length, id_dimension
VOCAB = 50                  # id_vocab
NL = 2                      # model_conf.mlp_layers (meta-classifier depth)
ATT_H0, ATT_H1 = 32, 16     # DIN attention-MLP hidden sizes

# Batch tile: multiple of 8 (sublane) and 128 (lane) so tiled blocks are legal
# when B > TB_MAX.  Sized by the per-sample K buffer (D*D*4B = 4 KB/sample);
# weights are VMEM-resident (~160 KB bf16) and never the constraint, even on
# v7x's 64 MiB VMEM.
TB_MAX = 256

# ---- packed-weight layouts ----------------------------------------------------
# 64-lane buffer: the two block-diagonal front-end stages.
W64_LAYOUT = [("fe0", 2 * D), ("fe1", 2 * D)]
# 32-lane buffer: everything else (K-stacked bands).
W32_LAYOUT = ([(f"mt_w{i}", D) for i in range(1, NL)]
              + [("att_w0", 3 * D), ("att_w1", D)]
              + [(f"hyper{i}", D * D + 2 * D) for i in range(NL)])


def _offsets(layout):
    off, out = 0, {}
    for name, rows in layout:
        out[name] = (off, rows)
        off += rows
    return out, off


W64_OFF, W64_ROWS = _offsets(W64_LAYOUT)          # 128 rows x 64 cols
W32_OFF, W32_ROWS = _offsets(W32_LAYOUT)          # 2336 rows x 32 cols (16-aligned)

# ---- packed-bias layout (each bias on an 8-aligned row of a (8*NB, 64) buffer)
B_LAYOUT = (["fe_b0", "fe_b1"] + [f"mt_b{i}" for i in range(1, NL)]
            + ["at_b0", "at_b1", "at_w2v", "at_b2"]
            + [f"hb_b{i}" for i in range(NL)])
B_OFF = {name: 8 * i for i, name in enumerate(B_LAYOUT)}
B_ROWS = 8 * len(B_LAYOUT)


# -----------------------------------------------------------------------------
# Pallas kernel: one batch tile per grid step, all parameters VMEM-resident.
# -----------------------------------------------------------------------------
def din_kernel(front_ref, ubm_ref, w64_ref, w32_ref, b_ref, out_ref):
    f32, bf16 = jnp.float32, jnp.bfloat16

    def w64(name):
        off, rows = W64_OFF[name]
        return w64_ref[off:off + rows, :]

    def w32(name):
        off, rows = W32_OFF[name]
        return w32_ref[off:off + rows, :]

    def bvec(name, cols):
        off = B_OFF[name]
        return b_ref[off:off + 1, 0:cols]

    def dot(a, w):
        # bf16 x bf16 MXU matmul with f32 accumulation
        return jnp.dot(a.astype(bf16), w, preferred_element_type=f32)

    front = front_ref[...]                      # (TB, 2D) = [target_embed | sel]
    ubm = ubm_ref[...]                          # (TB, L, D) masked user behaviour
    tb = front.shape[0]
    l, d = ubm.shape[1], ubm.shape[2]

    # ---- front-end: target transform and conditioning MLP layer 0 fused as
    #      block-diagonal matmuls over the lane-concatenated [tgt|sel]. ----
    ts = jnp.tanh(dot(front, w64("fe0")) + bvec("fe_b0", 2 * d))      # (TB, 2D)
    ts = dot(ts, w64("fe1")) + bvec("fe_b1", 2 * d)                    # (TB, 2D)
    t = ts[:, 0:d]                          # target transform output (linear)
    z = ts[:, d:2 * d]                      # conditioning MLP layer 0 (pre-act)
    for i in range(1, NL):
        z = jnp.tanh(z)                     # tanh between conditioning layers
        z = dot(z, w32(f"mt_w{i}")) + bvec(f"mt_b{i}", d)

    # ---- DIN attention pooling.  concat([q,k,q-k,q*k]) @ W0 folded into one
    #      K=3D matmul:  [ubm, q*ubm, q] @ [Wk-Wd; Wp; Wq+Wd]. ----
    ubm2 = ubm.reshape(tb * l, d)                                      # (TB*L, D)
    qf = jnp.broadcast_to(t[:, None, :], (tb, l, d)).reshape(tb * l, d)
    att_in = jnp.concatenate([ubm2, qf * ubm2, qf], axis=-1)           # (TB*L, 3D)
    h0 = jnp.maximum(dot(att_in, w32("att_w0")) + bvec("at_b0", ATT_H0), 0.0)
    h1 = jnp.maximum(dot(h0, w32("att_w1")) + bvec("at_b1", ATT_H0), 0.0)
    # (H1, 1) projection as a lane reduction (padded lanes are exact zeros)
    att = (jnp.sum(h1 * bvec("at_w2v", ATT_H0), axis=-1, keepdims=True)
           + bvec("at_b2", 1))                                         # (TB*L, 1)
    # padded rows of ubm are exact zeros, so re-masking `att` is redundant
    ui = jnp.sum((ubm2 * att).reshape(tb, l, d), axis=1)               # (TB, D)

    # ---- per-sample generated MLP (HyperNetwork_FC, batch=True):
    #      one fused (D*D + 2D)-deep MXU matmul per layer:
    #      out = [K, x, z] @ [hw_w.reshape(D*D,D); hw_b.reshape(D,D); hb_w] + hb_b
    #      with K[b, c*D+d] = z[b,c] * x[b,d]. ----
    x = ui
    for i in range(NL):
        K = (z[:, :, None] * x[:, None, :]).reshape(tb, d * d)         # (TB, D*D)
        lhs = jnp.concatenate(
            [K.astype(bf16), x.astype(bf16), z.astype(bf16)], axis=-1)
        x = dot(lhs, w32(f"hyper{i}")) + bvec(f"hb_b{i}", d)
        if i < NL - 1:
            x = jnp.tanh(x)

    # ---- final score: sum(user_embedding * target_embed, dim=1, keepdim) ----
    out_ref[...] = jnp.sum(x * t, axis=1, keepdims=True)               # (TB, 1)


# -----------------------------------------------------------------------------
# Wrapper: embedding gathers + no_grad preprocessing in XLA, rest in the kernel.
# -----------------------------------------------------------------------------
@jax.jit
def din_forward(alpha, click_seq, target_id, packed):
    f32 = jnp.float32
    id_emb = packed["id_embedding"]
    pos_emb = packed["pos_embedding"]
    clk = click_seq.astype(jnp.int32)
    b, l = clk.shape
    d = id_emb.shape[1]

    # IDEncoder lookups (pure gather glue)
    tgt = id_emb[target_id]                                            # (B, D)
    ub = id_emb[clk]                                                   # (B, L, D)
    pe = pos_emb[jnp.arange(l)]                                        # (L, D)

    # torch.no_grad() preprocessing, hoisted out of the kernel
    mask = (clk != 0).astype(f32)                                      # (B, L)
    seq_len = jnp.maximum(jnp.sum(mask, axis=1, keepdims=True) - 1.0, 0.0)
    pos = jnp.arange(l, dtype=f32)[None, :]                            # (1, L)
    pos_w = (1.0 / (1.0 + alpha * (float(l - 1) - pos))) * mask        # (B, L)
    selw = pos_w * (pos == seq_len).astype(f32)                        # (B, L)
    # weighted history at the last valid click (one-hot select before seq_trans)
    sel = jnp.sum((ub + pe[None, :, :]) * selw[:, :, None], axis=1)    # (B, D)
    front = jnp.concatenate([tgt, sel], axis=-1)                       # (B, 2D)
    ubm = ub * mask[:, :, None]                                        # (B, L, D)

    # batch grid (weights stay VMEM-resident across tiles)
    if b <= TB_MAX:
        tb, bp = b, b
    else:
        tb = TB_MAX
        bp = pl.cdiv(b, tb) * tb
    if bp != b:
        front = jnp.pad(front, ((0, bp - b), (0, 0)))
        ubm = jnp.pad(ubm, ((0, bp - b), (0, 0), (0, 0)))

    out = pl.pallas_call(
        din_kernel,
        out_shape=jax.ShapeDtypeStruct((bp, 1), jnp.float32),
        grid_spec=pltpu.PrefetchScalarGridSpec(
            num_scalar_prefetch=0,
            grid=(bp // tb,),
            in_specs=[
                pl.BlockSpec((tb, 2 * d), lambda i: (i, 0)),
                pl.BlockSpec((tb, l, d), lambda i: (i, 0, 0)),
                pl.BlockSpec((W64_ROWS, 2 * D), lambda i: (0, 0)),   # resident
                pl.BlockSpec((W32_ROWS, D), lambda i: (0, 0)),       # resident
                pl.BlockSpec((B_ROWS, 2 * D), lambda i: (0, 0)),     # resident
            ],
            out_specs=pl.BlockSpec((tb, 1), lambda i: (i, 0)),
        ),
        compiler_params=pltpu.CompilerParams(
            dimension_semantics=("parallel",)),
    )(front, ubm, packed["w64"], packed["w32"], packed["bias"])
    return out[:b]


# -----------------------------------------------------------------------------
# Parameter packing (done once, outside the hot path).
# -----------------------------------------------------------------------------
def pack_params(p):
    f32, bf16 = jnp.float32, jnp.bfloat16

    def blockdiag(a, b_):
        a = jnp.asarray(a, f32)
        b_ = jnp.asarray(b_, f32)
        ra, ca = a.shape
        rb, cb = b_.shape
        return jnp.block([[a, jnp.zeros((ra, cb), f32)],
                          [jnp.zeros((rb, ca), f32), b_]])

    # fold the attention concat [q,k,q-k,q*k] into per-operand weights
    at_w0 = jnp.asarray(p["at_w0"], f32)                   # (4D, H0)
    w_q, w_k = at_w0[0:D], at_w0[D:2 * D]
    w_dif, w_pr = at_w0[2 * D:3 * D], at_w0[3 * D:4 * D]

    w64_bands = {
        "fe0": blockdiag(p["tt_w0"], p["st_w"]),
        "fe1": blockdiag(p["tt_w1"], p["mt_w"][0]),
    }
    w32_bands = {f"mt_w{i}": p["mt_w"][i] for i in range(1, NL)}
    w32_bands["att_w0"] = jnp.concatenate(
        [w_k - w_dif, w_pr, w_q + w_dif], axis=0)          # [ubm | q*ubm | q]
    w32_bands["att_w1"] = jnp.pad(p["at_w1"], ((0, 0), (0, D - ATT_H1)))
    for i in range(NL):
        w32_bands[f"hyper{i}"] = jnp.concatenate(
            [p["hw_w"][i].reshape(D * D, D),               # bilinear (z ⊗ x) part
             p["hw_b"][i].reshape(D, D),                   # generated-weight bias
             p["hb_w"][i]], axis=0)                        # generated-bias weight

    w64 = jnp.concatenate([jnp.asarray(w64_bands[n], f32) for n, _ in W64_LAYOUT],
                          axis=0).astype(bf16)             # (128, 64) bf16
    w32 = jnp.concatenate([jnp.asarray(w32_bands[n], f32) for n, _ in W32_LAYOUT],
                          axis=0).astype(bf16)             # (2336, 32) bf16

    brows = {
        "fe_b0": jnp.concatenate([p["tt_b0"], p["st_b"]], axis=1),
        "fe_b1": jnp.concatenate([p["tt_b1"], p["mt_b"][0]], axis=1),
        "at_b0": p["at_b0"],
        "at_b1": p["at_b1"],
        "at_w2v": p["at_w2"].reshape(1, -1),
        "at_b2": p["at_b2"],
    }
    for i in range(1, NL):
        brows[f"mt_b{i}"] = p["mt_b"][i]
    for i in range(NL):
        brows[f"hb_b{i}"] = p["hb_b"][i]

    def _row8(v):
        v = jnp.asarray(v, f32).reshape(1, -1)
        return jnp.pad(v, ((0, 7), (0, 2 * D - v.shape[1])))   # (8, 64)

    bias = jnp.concatenate([_row8(brows[n]) for n in B_LAYOUT], axis=0)

    return {"id_embedding": jnp.asarray(p["id_embedding"], f32),
            "pos_embedding": jnp.asarray(p["pos_embedding"], f32),
            "w64": w64, "w32": w32, "bias": bias}


# -----------------------------------------------------------------------------
# Pure-JAX f32 reference: faithful, unrestructured translation of the forward.
# -----------------------------------------------------------------------------
def din_forward_ref(alpha, click_seq, target_id, params):
    f32 = jnp.float32
    id_emb = params["id_embedding"]
    pos_emb = params["pos_embedding"]
    clk = click_seq.astype(jnp.int32)
    b, l = clk.shape
    d = id_emb.shape[1]

    tgt_embed = id_emb[target_id]
    user_behavior = id_emb[clk]
    hist_pos_embed = jnp.broadcast_to(pos_emb[jnp.arange(l)][None], (b, l, d))

    mask = (clk != 0).astype(f32)
    seq_len = jnp.maximum(jnp.sum(mask, axis=1, keepdims=True) - 1.0, 0.0)
    pos = jnp.broadcast_to(jnp.arange(l, dtype=f32)[None, :], (b, l))
    pos_w = (1.0 / (1.0 + alpha * (float(l - 1) - pos))) * mask

    t = jnp.tanh(tgt_embed @ params["tt_w0"] + params["tt_b0"])
    t = t @ params["tt_w1"] + params["tt_b1"]

    hist = user_behavior + hist_pos_embed
    wh = hist * pos_w[:, :, None]
    wh = jnp.tanh(wh.reshape(b * l, d) @ params["st_w"] + params["st_b"]).reshape(b, l, d)

    ubm = user_behavior * mask[:, :, None]
    q = jnp.broadcast_to(t[:, None, :], (b, l, d))
    att_in = jnp.concatenate([q, ubm, q - ubm, q * ubm], axis=-1).reshape(b * l, 4 * d)
    h = jnp.maximum(att_in @ params["at_w0"] + params["at_b0"], 0.0)
    h = jnp.maximum(h @ params["at_w1"] + params["at_b1"], 0.0)
    att = (h @ params["at_w2"] + params["at_b2"]).reshape(b, l, 1)
    att = att * mask[:, :, None]
    user_interest = jnp.sum(ubm * att, axis=1)

    onehot = (pos == seq_len).astype(f32)
    z = jnp.sum(wh * onehot[:, :, None], axis=1)
    for i in range(NL):
        z = z @ params["mt_w"][i] + params["mt_b"][i]
        if i < NL - 1:
            z = jnp.tanh(z)

    x = user_interest[:, None, :]
    for i in range(NL):
        w_gen = (z @ params["hw_w"][i] + params["hw_b"][i]).reshape(b, d, d)
        b_gen = z @ params["hb_w"][i] + params["hb_b"][i]
        x = jnp.einsum("bqd,bde->bqe", x, w_gen) + b_gen[:, None, :]
        if i < NL - 1:
            x = jnp.tanh(x)
    user_embedding = x.reshape(b, d)
    return jnp.sum(user_embedding * t, axis=1, keepdims=True)


# -----------------------------------------------------------------------------
# Deterministic synthetic parameters (not a checkpoint load).
# -----------------------------------------------------------------------------
def init_params(key):
    keys = jax.random.split(key, 24)
    it = iter(keys)

    def w(shape, scale=0.08):
        return jax.random.normal(next(it), shape, jnp.float32) * scale

    return {
        "id_embedding": w((VOCAB, D), 0.1),
        "pos_embedding": w((VOCAB, D), 0.1),
        # _target_trans: D->D (tanh), D->D (linear)
        "tt_w0": w((D, D)), "tt_b0": w((1, D), 0.02),
        "tt_w1": w((D, D)), "tt_b1": w((1, D), 0.02),
        # _seq_trans: D->D (tanh)
        "st_w": w((D, D)), "st_b": w((1, D), 0.02),
        # AttentionPoolingLayer MLP: 4D -> 32 -> 16 -> 1
        "at_w0": w((4 * D, ATT_H0)), "at_b0": w((1, ATT_H0), 0.02),
        "at_w1": w((ATT_H0, ATT_H1)), "at_b1": w((1, ATT_H1), 0.02),
        "at_w2": w((ATT_H1, 1)), "at_b2": w((1, 1), 0.02),
        # HyperNetwork_FC: conditioning MLP (stacked over layers)
        "mt_w": w((NL, D, D)), "mt_b": w((NL, 1, D), 0.02),
        # HyperNetwork_FC: per-layer weight / bias generators (stacked)
        "hw_w": w((NL, D, D * D)), "hw_b": w((NL, 1, D * D), 0.02),
        "hb_w": w((NL, D, D)), "hb_b": w((NL, 1, D), 0.02),
    }


if __name__ == "__main__":
    key = jax.random.PRNGKey(0)
    pkey, ckey, tkey = jax.random.split(key, 3)
    params = init_params(pkey)
    packed = pack_params(params)

    # click sequence with id==0 padding at the tail (exercises mask / seq_length)
    click_seq = jax.random.randint(ckey, (B, L), 1, VOCAB, dtype=jnp.int32)
    click_seq = click_seq.at[0, 5:].set(0)
    click_seq = click_seq.at[1, 3:].set(0)
    target_id = jax.random.randint(tkey, (B,), 1, VOCAB, dtype=jnp.int32)
    alpha = jnp.array([1.0], dtype=jnp.float32)      # nn.Parameter alpha = 1.0

    out = jax.block_until_ready(din_forward(alpha, click_seq, target_id, packed))
    ref = din_forward_ref(alpha, click_seq, target_id, params)

    assert out.shape == (B, 1), out.shape
    # bf16 weights / MXU operands (f32 accumulation) -> relaxed tolerance vs f32 ref
    assert jnp.allclose(out, ref, rtol=5e-2, atol=2e-3), (out, ref)

    print("KERNEL_OK")
</pallas_src>

<mosaic_0001>
module attributes {stable_mosaic.version = 11 : i64} {
  func.func @din_kernel(%arg0: i32, %arg1: memref<2x64xf32, #tpu.memory_space<vmem>>, %arg2: memref<2x8x32xf32, #tpu.memory_space<vmem>>, %arg3: memref<128x64xbf16, #tpu.memory_space<vmem>>, %arg4: memref<2336x32xbf16, #tpu.memory_space<vmem>>, %arg5: memref<72x64xf32, #tpu.memory_space<vmem>>, %arg6: memref<2x1xf32, #tpu.memory_space<vmem>>) attributes {dimension_semantics = [#tpu.dimension_semantics<parallel>], iteration_bounds = array<i64: 1>, scalar_prefetch = 0 : i64, scratch_operands = 0 : i64, tpu.core_type = #tpu.core_type<tc>, window_params = [{transform_indices = @transform_0, window_bounds = array<i64: 2, 64>}, {transform_indices = @transform_1, window_bounds = array<i64: 2, 8, 32>}, {pipeline_mode = #tpu.pipeline_mode<synchronous>, transform_indices = @transform_2, window_bounds = array<i64: 128, 64>}, {pipeline_mode = #tpu.pipeline_mode<synchronous>, transform_indices = @transform_3, window_bounds = array<i64: 2336, 32>}, {pipeline_mode = #tpu.pipeline_mode<synchronous>, transform_indices = @transform_4, window_bounds = array<i64: 72, 64>}, {transform_indices = @transform_5, window_bounds = array<i64: 2, 1>}]} {
    %c0 = arith.constant 0 : index
    %c0_0 = arith.constant 0 : index
    %0 = vector.load %arg1[%c0, %c0_0] : memref<2x64xf32, #tpu.memory_space<vmem>>, vector<2x64xf32>
    %c0_1 = arith.constant 0 : index
    %c0_2 = arith.constant 0 : index
    %c0_3 = arith.constant 0 : index
    %1 = vector.load %arg2[%c0_1, %c0_2, %c0_3] : memref<2x8x32xf32, #tpu.memory_space<vmem>>, vector<2x8x32xf32>
    %c0_4 = arith.constant 0 : index
    %c0_5 = arith.constant 0 : index
    %2 = vector.load %arg3[%c0_4, %c0_5] : memref<128x64xbf16, #tpu.memory_space<vmem>>, vector<64x64xbf16>
    %3 = arith.truncf %0 : vector<2x64xf32> to vector<2x64xbf16>
    %cst = arith.constant dense<0.000000e+00> : vector<2x64xf32>
    %4 = tpu.matmul %3, %2, %cst {dimension_numbers = #tpu.dot_dimension_numbers<[1], [0], [0], [1], [0, 0, 1, 1], [], []>} : vector<2x64xbf16>, vector<64x64xbf16>, vector<2x64xf32> -> vector<2x64xf32>
    %c0_6 = arith.constant 0 : index
    %c0_7 = arith.constant 0 : index
    %5 = vector.load %arg5[%c0_6, %c0_7] : memref<72x64xf32, #tpu.memory_space<vmem>>, vector<1x64xf32>
    %6 = vector.broadcast %5 : vector<1x64xf32> to vector<2x64xf32>
    %7 = arith.addf %4, %6 : vector<2x64xf32>
    %8 = math.tanh %7 : vector<2x64xf32>
    %c64 = arith.constant 64 : index
    %c0_8 = arith.constant 0 : index
    %9 = vector.load %arg3[%c64, %c0_8] : memref<128x64xbf16, #tpu.memory_space<vmem>>, vector<64x64xbf16>
    %10 = arith.truncf %8 : vector<2x64xf32> to vector<2x64xbf16>
    %cst_9 = arith.constant dense<0.000000e+00> : vector<2x64xf32>
    %11 = tpu.matmul %10, %9, %cst_9 {dimension_numbers = #tpu.dot_dimension_numbers<[1], [0], [0], [1], [0, 0, 1, 1], [], []>} : vector<2x64xbf16>, vector<64x64xbf16>, vector<2x64xf32> -> vector<2x64xf32>
    %c8 = arith.constant 8 : index
    %c0_10 = arith.constant 0 : index
    %12 = vector.load %arg5[%c8, %c0_10] : memref<72x64xf32, #tpu.memory_space<vmem>>, vector<1x64xf32>
    %13 = vector.broadcast %12 : vector<1x64xf32> to vector<2x64xf32>
    %14 = arith.addf %11, %13 : vector<2x64xf32>
    %15 = vector.extract_strided_slice %14 {offsets = [0, 0], sizes = [2, 32], strides = [1, 1]} : vector<2x64xf32> to vector<2x32xf32>
    %16 = vector.extract_strided_slice %14 {offsets = [0, 32], sizes = [2, 32], strides = [1, 1]} : vector<2x64xf32> to vector<2x32xf32>
    %17 = math.tanh %16 : vector<2x32xf32>
    %c0_11 = arith.constant 0 : index
    %c0_12 = arith.constant 0 : index
    %18 = vector.load %arg4[%c0_11, %c0_12] : memref<2336x32xbf16, #tpu.memory_space<vmem>>, vector<32x32xbf16>
    %19 = arith.truncf %17 : vector<2x32xf32> to vector<2x32xbf16>
    %cst_13 = arith.constant dense<0.000000e+00> : vector<2x32xf32>
    %20 = tpu.matmul %19, %18, %cst_13 {dimension_numbers = #tpu.dot_dimension_numbers<[1], [0], [0], [1], [0, 0, 1, 1], [], []>} : vector<2x32xbf16>, vector<32x32xbf16>, vector<2x32xf32> -> vector<2x32xf32>
    %c16 = arith.constant 16 : index
    %c0_14 = arith.constant 0 : index
    %21 = vector.load %arg5[%c16, %c0_14] : memref<72x64xf32, #tpu.memory_space<vmem>>, vector<1x32xf32>
    %22 = vector.broadcast %21 : vector<1x32xf32> to vector<2x32xf32>
    %23 = arith.addf %20, %22 : vector<2x32xf32>
    %24 = vector.shape_cast %1 : vector<2x8x32xf32> to vector<16x32xf32>
    %25 = vector.shape_cast %15 : vector<2x32xf32> to vector<2x1x32xf32>
    %26 = vector.shape_cast %25 : vector<2x1x32xf32> to vector<2x1x32xf32>
    %27 = vector.broadcast %26 : vector<2x1x32xf32> to vector<2x8x32xf32>
    %28 = vector.shape_cast %27 : vector<2x8x32xf32> to vector<16x32xf32>
    %29 = arith.mulf %28, %24 : vector<16x32xf32>
    %30 = tpu.concatenate %24, %29, %28 in 1 : vector<16x32xf32>, vector<16x32xf32>, vector<16x32xf32> -> vector<16x96xf32>
    %c32 = arith.constant 32 : index
    %c0_15 = arith.constant 0 : index
    %31 = vector.load %arg4[%c32, %c0_15] : memref<2336x32xbf16, #tpu.memory_space<vmem>>, vector<96x32xbf16>
    %32 = arith.truncf %30 : vector<16x96xf32> to vector<16x96xbf16>
    %cst_16 = arith.constant dense<0.000000e+00> : vector<16x32xf32>
    %33 = tpu.matmul %32, %31, %cst_16 {dimension_numbers = #tpu.dot_dimension_numbers<[1], [0], [0], [1], [0, 0, 1, 1], [], []>} : vector<16x96xbf16>, vector<96x32xbf16>, vector<16x32xf32> -> vector<16x32xf32>
    %c24 = arith.constant 24 : index
    %c0_17 = arith.constant 0 : index
    %34 = vector.load %arg5[%c24, %c0_17] : memref<72x64xf32, #tpu.memory_space<vmem>>, vector<1x32xf32>
    %35 = vector.broadcast %34 : vector<1x32xf32> to vector<16x32xf32>
    %36 = arith.addf %33, %35 : vector<16x32xf32>
    %cst_18 = arith.constant 0.000000e+00 : f32
    %37 = vector.broadcast %cst_18 : f32 to vector<16x32xf32>
    %38 = arith.maximumf %36, %37 : vector<16x32xf32>
    %c128 = arith.constant 128 : index
    %c0_19 = arith.constant 0 : index
    %39 = vector.load %arg4[%c128, %c0_19] : memref<2336x32xbf16, #tpu.memory_space<vmem>>, vector<32x32xbf16>
    %40 = arith.truncf %38 : vector<16x32xf32> to vector<16x32xbf16>
    %cst_20 = arith.constant dense<0.000000e+00> : vector<16x32xf32>
    %41 = tpu.matmul %40, %39, %cst_20 {dimension_numbers = #tpu.dot_dimension_numbers<[1], [0], [0], [1], [0, 0, 1, 1], [], []>} : vector<16x32xbf16>, vector<32x32xbf16>, vector<16x32xf32> -> vector<16x32xf32>
    %c32_21 = arith.constant 32 : index
    %c0_22 = arith.constant 0 : index
    %42 = vector.load %arg5[%c32_21, %c0_22] : memref<72x64xf32, #tpu.memory_space<vmem>>, vector<1x32xf32>
    %43 = vector.broadcast %42 : vector<1x32xf32> to vector<16x32xf32>
    %44 = arith.addf %41, %43 : vector<16x32xf32>
    %cst_23 = arith.constant 0.000000e+00 : f32
    %45 = vector.broadcast %cst_23 : f32 to vector<16x32xf32>
    %46 = arith.maximumf %44, %45 : vector<16x32xf32>
    %c40 = arith.constant 40 : index
    %c0_24 = arith.constant 0 : index
    %47 = vector.load %arg5[%c40, %c0_24] : memref<72x64xf32, #tpu.memory_space<vmem>>, vector<1x32xf32>
    %48 = vector.broadcast %47 : vector<1x32xf32> to vector<16x32xf32>
    %49 = arith.mulf %46, %48 : vector<16x32xf32>
    %cst_25 = arith.constant dense<0.000000e+00> : vector<16xf32>
    %50 = vector.multi_reduction <add>, %49, %cst_25 [1] : vector<16x32xf32> to vector<16xf32>
    %51 = vector.shape_cast %50 : vector<16xf32> to vector<16x1xf32>
    %c48 = arith.constant 48 : index
    %c0_26 = arith.constant 0 : index
    %52 = vector.load %arg5[%c48, %c0_26] : memref<72x64xf32, #tpu.memory_space<vmem>>, vector<1x1xf32>
    %53 = vector.broadcast %52 : vector<1x1xf32> to vector<16x1xf32>
    %54 = arith.addf %51, %53 : vector<16x1xf32>
    %55 = vector.broadcast %54 : vector<16x1xf32> to vector<16x32xf32>
    %56 = arith.mulf %24, %55 : vector<16x32xf32>
    %57 = vector.shape_cast %56 : vector<16x32xf32> to vector<2x8x32xf32>
    %cst_27 = arith.constant dense<0.000000e+00> : vector<2x32xf32>
    %58 = vector.multi_reduction <add>, %57, %cst_27 [1] : vector<2x8x32xf32> to vector<2x32xf32>
    %59 = vector.shape_cast %23 : vector<2x32xf32> to vector<2x32x1xf32>
    %60 = vector.shape_cast %58 : vector<2x32xf32> to vector<2x1x32xf32>
    %61 = vector.broadcast %59 : vector<2x32x1xf32> to vector<2x32x32xf32>
    %62 = vector.broadcast %60 : vector<2x1x32xf32> to vector<2x32x32xf32>
    %63 = arith.mulf %61, %62 : vector<2x32x32xf32>
    %64 = vector.shape_cast %63 : vector<2x32x32xf32> to vector<2x1024xf32>
    %65 = arith.truncf %64 : vector<2x1024xf32> to vector<2x1024xbf16>
    %66 = arith.truncf %58 : vector<2x32xf32> to vector<2x32xbf16>
    %67 = arith.truncf %23 : vector<2x32xf32> to vector<2x32xbf16>
    %68 = tpu.concatenate %65, %66, %67 in 1 : vector<2x1024xbf16>, vector<2x32xbf16>, vector<2x32xbf16> -> vector<2x1088xbf16>
    %c160 = arith.constant 160 : index
    %c0_28 = arith.constant 0 : index
    %69 = vector.load %arg4[%c160, %c0_28] : memref<2336x32xbf16, #tpu.memory_space<vmem>>, vector<1088x32xbf16>
    %cst_29 = arith.constant dense<0.000000e+00> : vector<2x32xf32>
    %70 = tpu.matmul %68, %69, %cst_29 {dimension_numbers = #tpu.dot_dimension_numbers<[1], [0], [0], [1], [0, 0, 1, 1], [], []>} : vector<2x1088xbf16>, vector<1088x32xbf16>, vector<2x32xf32> -> vector<2x32xf32>
    %c56 = arith.constant 56 : index
    %c0_30 = arith.constant 0 : index
    %71 = vector.load %arg5[%c56, %c0_30] : memref<72x64xf32, #tpu.memory_space<vmem>>, vector<1x32xf32>
    %72 = vector.broadcast %71 : vector<1x32xf32> to vector<2x32xf32>
    %73 = arith.addf %70, %72 : vector<2x32xf32>
    %74 = math.tanh %73 : vector<2x32xf32>
    %75 = vector.shape_cast %23 : vector<2x32xf32> to vector<2x32x1xf32>
    %76 = vector.shape_cast %74 : vector<2x32xf32> to vector<2x1x32xf32>
    %77 = vector.broadcast %75 : vector<2x32x1xf32> to vector<2x32x32xf32>
    %78 = vector.broadcast %76 : vector<2x1x32xf32> to vector<2x32x32xf32>
    %79 = arith.mulf %77, %78 : vector<2x32x32xf32>
    %80 = vector.shape_cast %79 : vector<2x32x32xf32> to vector<2x1024xf32>
    %81 = arith.truncf %80 : vector<2x1024xf32> to vector<2x1024xbf16>
    %82 = arith.truncf %74 : vector<2x32xf32> to vector<2x32xbf16>
    %83 = arith.truncf %23 : vector<2x32xf32> to vector<2x32xbf16>
    %84 = tpu.concatenate %81, %82, %83 in 1 : vector<2x1024xbf16>, vector<2x32xbf16>, vector<2x32xbf16> -> vector<2x1088xbf16>
    %c1248 = arith.constant 1248 : index
    %c0_31 = arith.constant 0 : index
    %85 = vector.load %arg4[%c1248, %c0_31] : memref<2336x32xbf16, #tpu.memory_space<vmem>>, vector<1088x32xbf16>
    %cst_32 = arith.constant dense<0.000000e+00> : vector<2x32xf32>
    %86 = tpu.matmul %84, %85, %cst_32 {dimension_numbers = #tpu.dot_dimension_numbers<[1], [0], [0], [1], [0, 0, 1, 1], [], []>} : vector<2x1088xbf16>, vector<1088x32xbf16>, vector<2x32xf32> -> vector<2x32xf32>
    %c64_33 = arith.constant 64 : index
    %c0_34 = arith.constant 0 : index
    %87 = vector.load %arg5[%c64_33, %c0_34] : memref<72x64xf32, #tpu.memory_space<vmem>>, vector<1x32xf32>
    %88 = vector.broadcast %87 : vector<1x32xf32> to vector<2x32xf32>
    %89 = arith.addf %86, %88 : vector<2x32xf32>
    %90 = arith.mulf %89, %15 : vector<2x32xf32>
    %cst_35 = arith.constant dense<0.000000e+00> : vector<2xf32>
    %91 = vector.multi_reduction <add>, %90, %cst_35 [1] : vector<2x32xf32> to vector<2xf32>
    %92 = vector.shape_cast %91 : vector<2xf32> to vector<2x1xf32>
    %c0_36 = arith.constant 0 : index
    %c0_37 = arith.constant 0 : index
    %93 = vector.load %arg6[%c0_36, %c0_37] : memref<2x1xf32, #tpu.memory_space<vmem>>, vector<2x1xf32>
    tpu.vector_store %arg6[%c0_36, %c0_37], %92 {strides = array<i32>} : memref<2x1xf32, #tpu.memory_space<vmem>>, vector<2x1xf32>,
    return
  }
  func.func @transform_0(%arg0: i32) -> (i32, i32) {
    %c0_i32 = arith.constant 0 : i32
    %c0_i32_0 = arith.constant 0 : i32
    return %arg0, %c0_i32 : i32, i32
  }
  func.func @transform_1(%arg0: i32) -> (i32, i32, i32) {
    %c0_i32 = arith.constant 0 : i32
    %c0_i32_0 = arith.constant 0 : i32
    %c0_i32_1 = arith.constant 0 : i32
    return %arg0, %c0_i32, %c0_i32_0 : i32, i32, i32
  }
  func.func @transform_2(%arg0: i32) -> (i32, i32) {
    %c0_i32 = arith.constant 0 : i32
    %c0_i32_0 = arith.constant 0 : i32
    %c0_i32_1 = arith.constant 0 : i32
    return %c0_i32, %c0_i32_0 : i32, i32
  }
  func.func @transform_3(%arg0: i32) -> (i32, i32) {
    %c0_i32 = arith.constant 0 : i32
    %c0_i32_0 = arith.constant 0 : i32
    %c0_i32_1 = arith.constant 0 : i32
    return %c0_i32, %c0_i32_0 : i32, i32
  }
  func.func @transform_4(%arg0: i32) -> (i32, i32) {
    %c0_i32 = arith.constant 0 : i32
    %c0_i32_0 = arith.constant 0 : i32
    %c0_i32_1 = arith.constant 0 : i32
    return %c0_i32, %c0_i32_0 : i32, i32
  }
  func.func @transform_5(%arg0: i32) -> (i32, i32) {
    %c0_i32 = arith.constant 0 : i32
    %c0_i32_0 = arith.constant 0 : i32
    return %arg0, %c0_i32 : i32, i32
  }
}

</mosaic_0001>

<bundles_post_ra>
// kernel: din_forward.1
= control target key start
LH: loop header
LB: loop body
LE: loop exit
PB: predicated region body
PF: predicated region fallthrough
CT: control target
= control target key end

     0   :  { %v3690_v0 = vmov 0.0   ;;  %vm3691_vm0 = vmmov 0   ;;  %vm62_vm1 = vcmask 523264   ;;  %v3692_v24 = vmov 1966171168   ;;  %s3693_s7 = smov 32   ;;  %s4705_s2 = inlined_call_operand.vmem [shape: bf16[128,64], index: 2, kind: input, shape index: {}]   ;;  %s4706_s0 = inlined_call_operand.vmem [shape: f32[2,64], index: 0, kind: input, shape index: {}]   ;;  %s4707_s4 = inlined_call_operand.vmem [shape: f32[72,64], index: 4, kind: input, shape index: {}]   ;;  %s4708_s3 = inlined_call_operand.vmem [shape: bf16[2336,32], index: 3, kind: input, shape index: {}]   ;;  %s4709_s1 = inlined_call_operand.vmem [shape: f32[2,8,32], index: 1, kind: input, shape index: {}]   ;;  %s4710_s5 = inlined_call_operand.vmem [shape: f32[2,1], index: 5, kind: output, shape index: {}]  }
   0x1   :  { %3309 = vmatprep.subr.bf16.mxu0 %v3690_v0  ;;  %v3530_v1 = vld [vmem:[%s4705_s2 + $0x18] sm:$0xff]   ;;  %3317 = vmatprep.mubr.msk.bf16.mxu0 %vm3691_vm0, %v3690_v0  ;;  %v3531_v2 = vld [vmem:[%s4705_s2 + $0x10] sm:$0xff]   ;;  %v3532_v3 = vld [vmem:[%s4705_s2 + $0x8] sm:$0xff]   ;;  %v260_v25 = vunpack.c.l.s4 %v3692_v24  ;;  %v262_v26 = vlaneseq  ;;  %s3694_s8 = smov 64   ;;  %s3695_s9 = smov 96   ;;  %vm214_vm2 = vcmask 261120  }
   0x2   :  { %3321 = vmatprep.subr.bf16.mxu1 %v3690_v0  ;;  %3329 = vmatprep.mubr.msk.bf16.mxu1 %vm3691_vm0, %v3690_v0  ;;  %v3533_v4 = vld [vmem:[%s4705_s2] sm:$0xff]   ;;  %v3534_v7 = vld [vmem:[%s4705_s2 + $0x38] sm:$0xff]   ;;  %v3535_v8 = vld [vmem:[%s4705_s2 + $0x30] sm:$0xff]   ;;  %vm365_vm3 = vcmask 785408   ;;  %vm971_vm4 = vcmask 1041409   ;;  %vm2920_vm5 = vcmask 254976  }
   0x3   :  { %3310 = vmatpush3.bf16.msra.mxu0 %v3530_v1  ;;  %v21_v5 = vld [vmem:[%s4706_s0] sm:$0x3]  ;;  %3322 = vmatpush3.bf16.msra.mxu1 %v3534_v7  ;;  %v3536_v9 = vld [vmem:[%s4705_s2 + $0x28] sm:$0xff]   ;;  %v3538_v19 = vld [vmem:[%s4708_s3 + $0x38] sm:$0xff]   ;;  %v261_v27 = vunpack.c.0.s8 %v260_v25  ;;  %v3799_v28 = vshrl.u32 %v262_v26, 7  ;;  %vm2924_vm6 = vcmask 1024  }
   0x4   :  { %3311 = vmatprep.subr.bf16.mxu0 %v3690_v0  ;;  %v32_v6 = vpack.c.bf16 %v21_v5, %v21_v5  ;;  %3323 = vmatprep.subr.bf16.mxu1 %v3690_v0  ;;  %v3537_v10 = vld [vmem:[%s4705_s2 + $0x20] sm:$0xff]   ;;  %v3539_v20 = vld [vmem:[%s4708_s3 + $0x30] sm:$0xff]   ;;  %v3541_v21 = vld [vmem:[%s4708_s3 + $0x8] sm:$0xff]  }
   0x5   :  { %v2930_v11 = vld [vmem:[%s4707_s4] ss:$0 sm:$0xff]  ;;  %v3540_v22 = vld [vmem:[%s4708_s3 + $0x28] sm:$0xff]   ;;  %v3805_v30 = vsub.s32 %v261_v27, %v3799_v28  ;;  %v3544_v35 = vld [vmem:[%s4708_s3 + $0x18] sm:$0xff]   ;;  %v3818_v37 = vsub.s32 0, %v3799_v28 }
   0x6   :  { %v3542_v23 = vld [vmem:[%s4708_s3 + $0x20] sm:$0xff]   ;;  %v2936_v29 = vld [vmem:[%s4707_s4 + $0x8] ss:$0 sm:$0xff]  ;;  %v3545_v42 = vld [vmem:[%s4708_s3 + $0x10] sm:$0xff]  }
   0x7   :  { %3312 = vmatpush3.bf16.msra.mxu0 %v3531_v2  ;;  %3324 = vmatpush3.bf16.msra.mxu1 %v3535_v8  ;;  %v3543_v33 = vld [vmem:[%s4708_s3] sm:$0xff]   ;;  %v3837_v46 = vld [vmem:[%s4709_s1 + $0x8] sm:$0xff]  ;;  %v2946_v8 = vld [vmem:[%s4707_s4 + $0x18] ss:$0 sm:$0xff] }
   0x8   :  { %3313 = vmatprep.subr.bf16.mxu0 %v3690_v0  ;;  %3325 = vmatprep.subr.bf16.mxu1 %v3690_v0  ;;  %v3832_v45 = vld [vmem:[%s4709_s1] sm:$0xff] }
   0xb   :  { %3314 = vmatpush3.bf16.msra.mxu0 %v3532_v3  ;;  %3326 = vmatpush3.bf16.msra.mxu1 %v3536_v9  ;;  %v3546_v3 = vld [vmem:[%s4708_s3 + $0x48] sm:$0xff]  }
   0xc   :  { %3315 = vmatprep.subr.bf16.mxu0 %v3690_v0  ;;  %3327 = vmatprep.subr.bf16.mxu1 %v3690_v0 }
   0xf   :  { %3316 = vmatpush3.bf16.msra.mxu0 %v3533_v4  ;;  %3328 = vmatpush3.bf16.msra.mxu1 %v3537_v10  ;;  %v3547_v4 = vld [vmem:[%s4708_s3 + $0x40] sm:$0xff]  }
  0x10   :  { %3333 = vmatprep.subr.bf16.mxu0 %v3690_v0  ;;  %3341 = vmatprep.subr.bf16.mxu1 %v3690_v0 }
  0x12   :  { %3318 = vmatmul.mubr.msk.bf16.vlgmr.msra.gmra.mxu0 %vm62_vm1, %v32_v6 }
  0x13   :  { %3337 = vmatprep.mubr.msk.bf16.mxu0 %vm3691_vm0, %v3690_v0  ;;  %3334 = vmatpush3.bf16.msra.mxu0 %v3541_v21 }
  0x14   :  { %3335 = vmatprep.subr.bf16.mxu0 %v3690_v0 }
  0x17   :  { %3336 = vmatpush3.bf16.msra.mxu0 %v3543_v33 }
  0x18   :  { %3357 = vmatprep.subr.bf16.mxu0 %v3690_v0 }
  0xd2   :  { %v100_v12 = vpop.f32.mrf.mxu0 }
  0xd3   :  { %v101_v13 = vadd.f32 %v2930_v11, %v100_v12 }
  0xd4   :  { %v3319_v14 = vpop.f32.mrf.mxu0 }
  0xd5   :  { %3684 = vtanh.f32 %v101_v13 }
  0xd6   :  { %v103_v15 = vpop.f32.mrf.mxu0 }
  0xd8   :  { %v3320_v16 = vpop.f32.mrf.mxu0 }
  0xe2   :  { %v3685_v17 = vpop.eup %3684 }
  0xe3   :  { %v115_v18 = vpack.c.bf16 %v3685_v17, %v3685_v17 }
  0xe5   :  { %3330 = vmatmul.mubr.msk.bf16.vlgmr.msra.gmra.mxu1 %vm62_vm1, %v115_v18 }
  0xe6   :  { %3353 = vmatprep.mubr.msk.bf16.mxu1 %vm3691_vm0, %v3690_v0  ;;  %3342 = vmatpush3.bf16.msra.mxu1 %v3538_v19  ;;  %v2954_v19 = vld [vmem:[%s4707_s4 + $0x20] ss:$0 sm:$0xff] }
  0xe7   :  { %3343 = vmatprep.subr.bf16.mxu1 %v3690_v0 }
  0xea   :  { %3344 = vmatpush3.bf16.msra.mxu1 %v3539_v20 }
  0xeb   :  { %3345 = vmatprep.subr.bf16.mxu1 %v3690_v0 }
  0xee   :  { %3346 = vmatpush3.bf16.msra.mxu1 %v3540_v22 }
  0xef   :  { %3347 = vmatprep.subr.bf16.mxu1 %v3690_v0 }
  0xf2   :  { %3348 = vmatpush3.bf16.msra.mxu1 %v3542_v23  ;;  %v2958_v23 = vld [vmem:[%s4707_s4 + $0x28] ss:$0 sm:$0xff] }
  0xf3   :  { %3349 = vmatprep.subr.bf16.mxu1 %v3690_v0 }
  0xf6   :  { %3350 = vmatpush3.bf16.msra.mxu1 %v3544_v35 }
  0xf7   :  { %3351 = vmatprep.subr.bf16.mxu1 %v3690_v0 }
  0xfa   :  { %3352 = vmatpush3.bf16.msra.mxu1 %v3545_v42  ;;  %v547_v42 = vsub.s32 1, %v3799_v28 }
 0x1a5   :  { %v182_v31 = vpop.f32.mrf.mxu1 }
 0x1a6   :  { %v3807_v32 = vadd.f32 %v2936_v29, %v182_v31 }
 0x1a7   :  { %v3331_v34 = vpop.f32.mrf.mxu1 }
 0x1a8   :  { %v265_v36 = vrot.slane %v3807_v32, %v3805_v30  ;;  %3686 = vtanh.f32 %v3807_v32 }
 0x1a9   :  { %v185_v38 = vpop.f32.mrf.mxu1 }
 0x1aa   :  { %v266_v39 = vcombine.high %v265_v36, %v265_v36  ;;  %v273_v40 = vrot.slane %v265_v36, %v3805_v30  ;;  %v3696_v36 = vmov 0   ;;  %v2942_v38 = vld [vmem:[%s4707_s4 + $0x10] ss:$0 sm:$0xff] }
 0x1ab   :  { %v3332_v41 = vpop.f32.mrf.mxu1  ;;  %3408 = vset.pattern.permute.xlu0 %v3696_v36  ;;  %3409 = vset.pattern.permute.xlu1 %v3696_v36 }
 0x1ac   :  { %v280_v43 = vrot.slane %v266_v39, %v3805_v30  ;;  %v284_v44 = vrot.slane %v273_v40, %v3818_v37  ;;  %v2959_v39 = vld [vmem:[%s4707_s4 + $0x30] ss:$0 sm:$0xff] }
 0x1ae   :  { %v288_v47 = vrot.slane %v280_v43, %v3818_v37  ;;  %v291_v48 = vmul.f32 %v284_v44, %v3832_v45 }
 0x1b0   :  { %v292_v49 = vmul.f32 %v288_v47, %v3837_v46  ;;  %v3403_v52 = vpack.i.bf16 %v288_v47, %v284_v44 }
 0x1b2   :  { %v3398_v50 = vpack.i.bf16 %v292_v49, %v291_v48 }
 0x1b4   :  { %3399 = vrot.lane.b32.xlu0 %v3398_v50, %s3693_s7  ;;  %v3548_v50 = vld [vmem:[%s4708_s3 + $0xc8] sm:$0xff]  }
 0x1b5   :  { %v3687_v51 = vpop.eup %3686 }
 0x1b6   :  { %v193_v53 = vpack.c.bf16 %v3687_v51, %v3687_v51  ;;  %v3549_v51 = vld [vmem:[%s4708_s3 + $0x88] sm:$0xff]  }
 0x1b8   :  { %3404 = vrot.lane.b32.xlu0 %v3403_v52, %s3694_s8  ;;  %200 = vrot.lane.b32.xlu1 %v193_v53, %s3695_s9  ;;  %v3550_v52 = vld [vmem:[%s4708_s3 + $0xc0] sm:$0xff]   ;;  %v3552_v53 = vld [vmem:[%s4708_s3 + $0x148] sm:$0xff]  }
 0x1b9   :  { %3145 = vmatprep.subr.bf16.mxu1 %v3552_v53 }
 0x226   :  { %v3400_v54 = vpop.permute.xlu0 %3399 }
 0x227   :  { %v3402_v55 = vunpack.i.h.bf16 %v3400_v54  ;;  %v3401_v56 = vunpack.i.l.bf16 %v3400_v54  ;;  %v3553_v54 = vld [vmem:[%s4708_s3 + $0x108] sm:$0xff]  }
 0x229   :  { %v308_v61 = vsel %vm214_vm2, %v3837_v46, %v3402_v55  ;;  %v307_v62 = vsel %vm214_vm2, %v3832_v45, %v3401_v56  ;;  %v3556_v55 = vld [vmem:[%s4708_s3 + $0x140] sm:$0xff]  }
 0x22a   :  { %v3405_v57 = vpop.permute.xlu0 %3404  ;;  %v201_v58 = vpop.permute.xlu1 %200  ;;  %v3551_v56 = vld [vmem:[%s4708_s3 + $0x80] sm:$0xff]  }
 0x22b   :  { %v3407_v59 = vunpack.i.h.bf16 %v3405_v57  ;;  %v3406_v60 = vunpack.i.l.bf16 %v3405_v57  ;;  %3338 = vmatmul.mubr.msk.bf16.vlgmr.msra.gmra.mxu0 %vm214_vm2, %v201_v58  ;;  %v3554_v57 = vld [vmem:[%s4708_s3 + $0xb8] sm:$0xff]   ;;  %v3557_v58 = vld [vmem:[%s4708_s3 + $0x100] sm:$0xff]  }
 0x22c   :  { %3361 = vmatprep.mubr.msk.bf16.mxu0 %vm3691_vm0, %v3690_v0  ;;  %3358 = vmatpush3.bf16.msra.mxu0 %v3546_v3  ;;  %v3565_v3 = vld [vmem:[%s4708_s3 + $0xf0] sm:$0xff]  }
 0x22d   :  { %v309_v63 = vsel %vm62_vm1, %v307_v62, %v3406_v60  ;;  %v310_v1 = vsel %vm62_vm1, %v308_v61, %v3407_v59  ;;  %3359 = vmatprep.subr.bf16.mxu0 %v3690_v0  ;;  %v3560_v59 = vld [vmem:[%s4708_s3 + $0x138] sm:$0xff]   ;;  %v3558_v61 = vld [vmem:[%s4708_s3 + $0xb0] sm:$0xff]  }
 0x22e   :  { %v323_v2 = vpack.c.bf16 %v310_v1, %v309_v63  ;;  %v3555_v60 = vld [vmem:[%s4708_s3 + $0x78] sm:$0xff]   ;;  %v3564_v63 = vld [vmem:[%s4708_s3 + $0x130] sm:$0xff]  }
 0x22f   :  { %v3561_v62 = vld [vmem:[%s4708_s3 + $0xf8] sm:$0xff]   ;;  %v3559_v1 = vld [vmem:[%s4708_s3 + $0x70] sm:$0xff]  }
 0x230   :  { %3354 = vmatmul.mubr.msk.bf16.vlgmr.msra.gmra.mxu1 %vm365_vm3, %v323_v2  ;;  %3360 = vmatpush3.bf16.msra.mxu0 %v3547_v4  ;;  %v3562_v2 = vld [vmem:[%s4708_s3 + $0xa8] sm:$0xff]  }
 0x231   :  { %3123 = vmatprep.subr.bf16.mxu0 %v3548_v50  ;;  %3146 = vmatpush3.bf16.msra.mxu1 %v3553_v54  ;;  %v3563_v4 = vld [vmem:[%s4708_s3 + $0x68] sm:$0xff]  }
 0x232   :  { %3147 = vmatprep.subr.bf16.mxu1 %v3556_v55 }
 0x235   :  { %3148 = vmatpush3.bf16.msra.mxu1 %v3557_v58  ;;  %v3570_v58 = vld [vmem:[%s4708_s3 + $0x98] sm:$0xff]  }
 0x236   :  { %3149 = vmatprep.subr.bf16.mxu1 %v3560_v59 }
 0x239   :  { %3150 = vmatpush3.bf16.msra.mxu1 %v3561_v62 }
 0x23a   :  { %3151 = vmatprep.subr.bf16.mxu1 %v3564_v63 }
 0x23d   :  { %3152 = vmatpush3.bf16.msra.mxu1 %v3565_v3 }
 0x2eb   :  { %v252_v5 = vpop.f32.mrf.mxu0 }
 0x2ec   :  { %v3880_v41 = vadd.f32 %v2942_v38, %v252_v5  ;;  %v3566_v5 = vld [vmem:[%s4708_s3 + $0xa0] sm:$0xff]  }
 0x2ed   :  { %v3339_v6 = vpop.f32.mrf.mxu0 }
 0x2ee   :  { %v548_v47 = vrot.slane %v3880_v41, %v547_v42  ;;  %v529_v49 = vrot.slane %v3880_v41, %v3818_v37  ;;  %v3569_v42 = vld [vmem:[%s4708_s3 + $0xe8] sm:$0xff]  }
 0x2ef   :  { %v255_v7 = vpop.f32.mrf.mxu0 }
 0x2f0   :  { %v403_v9 = vpop.f32.mrf.mxu1 }
 0x2f1   :  { %v3340_v10 = vpop.f32.mrf.mxu0  ;;  %v404_v12 = vadd.f32 %v2946_v8, %v403_v9 }
 0x2f2   :  { %v3355_v11 = vpop.f32.mrf.mxu1 }
 0x2f3   :  { %v410_v16 = vmax.f32 %v404_v12, 0.0 }
 0x2f4   :  { %v406_v13 = vpop.f32.mrf.mxu1 }
 0x2f5   :  { %v407_v14 = vadd.f32 %v2946_v8, %v406_v13 }
 0x2f6   :  { %v3356_v15 = vpop.f32.mrf.mxu1 }
 0x2f7   :  { %v411_v17 = vmax.f32 %v407_v14, 0.0 }
 0x2f9   :  { %v416_v18 = vpack.c.bf16 %v411_v17, %v410_v16  ;;  %v3697_v17 = vmov 1983009808  }
 0x2fb   :  { %3362 = vmatmul.mubr.msk.bf16.vlgmr.msra.gmra.mxu0 %vm214_vm2, %v416_v18  ;;  %v574_v18 = vunpack.c.l.s4 %v3697_v17 }
 0x2fc   :  { %3124 = vmatpush3.bf16.msra.mxu0 %v3549_v51 }
 0x2fd   :  { %3125 = vmatprep.subr.bf16.mxu0 %v3550_v52 }
 0x300   :  { %3126 = vmatpush3.bf16.msra.mxu0 %v3551_v56 }
 0x301   :  { %3127 = vmatprep.subr.bf16.mxu0 %v3554_v57 }
 0x304   :  { %3128 = vmatpush3.bf16.msra.mxu0 %v3555_v60 }
 0x305   :  { %3129 = vmatprep.subr.bf16.mxu0 %v3558_v61 }
 0x308   :  { %3130 = vmatpush3.bf16.msra.mxu0 %v3559_v1  ;;  %v3571_v1 = vld [vmem:[%s4708_s3 + $0x58] sm:$0xff]  }
 0x309   :  { %3131 = vmatprep.subr.bf16.mxu0 %v3562_v2  ;;  %v3572_v2 = vld [vmem:[%s4708_s3 + $0x120] sm:$0xff]  }
 0x30c   :  { %3132 = vmatpush3.bf16.msra.mxu0 %v3563_v4 }
 0x30d   :  { %3133 = vmatprep.subr.bf16.mxu0 %v3566_v5 }
 0x3bb   :  { %v471_v20 = vpop.f32.mrf.mxu0 }
 0x3bc   :  { %v472_v21 = vadd.f32 %v2954_v19, %v471_v20 }
 0x3bd   :  { %v3363_v22 = vpop.f32.mrf.mxu0 }
 0x3be   :  { %v478_v24 = vmax.f32 %v472_v21, 0.0 }
 0x3bf   :  { %v474_v25 = vpop.f32.mrf.mxu0 }
 0x3c0   :  { %v475_v26 = vadd.f32 %v2954_v19, %v474_v25  ;;  %v485_v27 = vmul.f32 %v2958_v23, %v478_v24  ;;  %v575_v25 = vunpack.c.0.s8 %v574_v18 }
 0x3c1   :  { %v3364_v29 = vpop.f32.mrf.mxu0 }
 0x3c2   :  { %v479_v31 = vmax.f32 %v475_v26, 0.0  ;;  %v487_v33 = vsel %vm214_vm2, %v485_v27, 0.0 }
 0x3c3   :  { %488 = vadd.xlane.f32.xlu1 %v487_v33 }
 0x3c4   :  { %v486_v34 = vmul.f32 %v2958_v23, %v479_v31  ;;  %v3698_v23 = vmov 1934713408  }
 0x3c5   :  { %v605_v24 = vunpack.c.l.s4 %v3698_v23  ;;  %v3575_v23 = vld [vmem:[%s4708_s3 + $0x50] sm:$0xff]  }
 0x3c6   :  { %v490_v35 = vsel %vm214_vm2, %v486_v34, 0.0 }
 0x3c7   :  { %491 = vadd.xlane.f32.xlu0 %v490_v35  ;;  %v606_v33 = vunpack.c.0.s8 %v605_v24  ;;  %v3960_v35 = vsub.s32 %v575_v25, %v3799_v28  ;;  %v3576_v24 = vld [vmem:[%s4708_s3 + $0x118] sm:$0xff]  }
 0x3c8   :  { %v3577_v25 = vld [vmem:[%s4708_s3 + $0xd8] sm:$0xff]  }
 0x44c   :  { %v489_v40 = vpop.xlane.xlu1 %488 }
 0x44d   :  { %v498_v43 = vadd.f32 %v2959_v39, %v489_v40  ;;  %v3568_v40 = vld [vmem:[%s4708_s3 + $0x128] sm:$0xff]  }
 0x44e   :  { %3153 = vmatprep.subr.bf16.mxu1 %v3568_v40 }
 0x44f   :  { %502 = vperm.xlu0 %3408, %v498_v43   ;;  %3154 = vmatpush3.bf16.msra.mxu1 %v3569_v42 }
 0x450   :  { %v492_v44 = vpop.xlane.xlu0 %491  ;;  %3155 = vmatprep.subr.bf16.mxu1 %v3572_v2 }
 0x451   :  { %v499_v48 = vadd.f32 %v2959_v39, %v492_v44  ;;  %v3567_v39 = vld [vmem:[%s4708_s3 + $0x60] sm:$0xff]  }
 0x452   :  { %3134 = vmatpush3.bf16.msra.mxu0 %v3567_v39 }
 0x453   :  { %562 = vbcast.lane.b32.xlu0 %v548_v47, 280  ;;  %507 = vperm.xlu1 %3409, %v499_v48   ;;  %v3980_v48 = vsub.s32 %v606_v33, %v3799_v28 }
 0x454   :  { %3135 = vmatprep.subr.bf16.mxu0 %v3570_v58 }
 0x456   :  { %3136 = vmatpush3.bf16.msra.mxu0 %v3571_v1 }
 0x457   :  { %531 = vbcast.lane.b32.xlu1 %v529_v49, 256 }
 0x45b   :  { %550 = vbcast.lane.b32.xlu1 %v548_v47, 256 }
 0x45f   :  { %535 = vbcast.lane.b32.xlu1 %v529_v49, 264 }
 0x463   :  { %554 = vbcast.lane.b32.xlu1 %v548_v47, 264 }
 0x467   :  { %539 = vbcast.lane.b32.xlu1 %v529_v49, 272 }
 0x46b   :  { %558 = vbcast.lane.b32.xlu1 %v548_v47, 272 }
 0x46f   :  { %543 = vbcast.lane.b32.xlu1 %v529_v49, 280 }
 0x4ca   :  { %v503_v6 = vpop.permute.xlu0 %502 }
 0x4cb   :  { %v510_v7 = vmul.f32 %v503_v6, %v3832_v45 }
 0x4cd   :  { %v512_v8 = vsel %vm214_vm2, %v510_v7, 0.0  ;;  %v3573_v7 = vld [vmem:[%s4708_s3 + $0xe0] sm:$0xff]  }
 0x4ce   :  { %v513_v9 = vrot.slane %v512_v8, 4  ;;  %v508_v10 = vpop.permute.xlu1 %507  ;;  %v3984_v50 = vpop.permute.xlu0 %562  ;;  %3156 = vmatpush3.bf16.msra.mxu1 %v3573_v7 }
 0x4cf   :  { %v511_v11 = vmul.f32 %v508_v10, %v3837_v46  ;;  %3157 = vmatprep.subr.bf16.mxu1 %v3576_v24 }
 0x4d0   :  { %v514_v12 = vadd.f32 %v513_v9, %v512_v8 }
 0x4d1   :  { %v519_v13 = vsel %vm214_vm2, %v511_v11, 0.0 }
 0x4d2   :  { %v515_v14 = vrot.slane %v514_v12, 2  ;;  %v520_v15 = vrot.slane %v519_v13, 4  ;;  %v3947_v16 = vpop.permute.xlu1 %531  ;;  %3158 = vmatpush3.bf16.msra.mxu1 %v3577_v25 }
 0x4d4   :  { %v516_v19 = vadd.f32 %v515_v14, %v514_v12  ;;  %v521_v20 = vadd.f32 %v520_v15, %v519_v13  ;;  %v3574_v15 = vld [vmem:[%s4708_s3 + $0x90] sm:$0xff]  }
 0x4d5   :  { %3137 = vmatprep.subr.bf16.mxu0 %v3574_v15 }
 0x4d6   :  { %v517_v21 = vrot.slane %v516_v19, 1  ;;  %v522_v22 = vrot.slane %v521_v20, 2  ;;  %v3949_v45 = vpop.permute.xlu1 %550  ;;  %3138 = vmatpush3.bf16.msra.mxu0 %v3575_v23 }
 0x4d8   :  { %v3951_v26 = vadd.f32 %v517_v21, %v516_v19  ;;  %v523_v46 = vadd.f32 %v522_v22, %v521_v20 }
 0x4da   :  { %v524_v27 = vrot.slane %v523_v46, 1  ;;  %v564_v29 = vmul.f32 %v3947_v16, %v3951_v26  ;;  %v3955_v31 = vpop.permute.xlu1 %535  ;;  %v964_v11 = vpack.c.bf16 %v3951_v26, %v3951_v26 }
 0x4db   :  { %v565_v34 = vmul.f32 %v3955_v31, %v3951_v26 }
 0x4dc   :  { %v3962_v36 = vadd.f32 %v524_v27, %v523_v46  ;;  %v572_v38 = vcombine.high %v564_v29, %v3690_v0  ;;  %v579_v51 = vrot.slane %v564_v29, %v3960_v35 }
 0x4dd   :  { %v638_v44 = vcombine.high %v565_v34, %v3690_v0  ;;  %v645_v54 = vrot.slane %v565_v34, %v3960_v35 }
 0x4de   :  { %v568_v43 = vmul.f32 %v3949_v45, %v3962_v36  ;;  %v3977_v47 = vpop.permute.xlu1 %554  ;;  %v3992_v28 = vmul.f32 %v3984_v50, %v3962_v36  ;;  %v586_v55 = vrot.slane %v572_v38, %v3960_v35  ;;  %v965_v17 = vpack.c.bf16 %v3962_v36, %v3962_v36 }
 0x4df   :  { %v569_v49 = vmul.f32 %v3977_v47, %v3962_v36  ;;  %v652_v62 = vrot.slane %v638_v44, %v3960_v35 }
 0x4e0   :  { %v587_v52 = vcombine.high %v568_v43, %v3690_v0  ;;  %v594_v53 = vrot.slane %v568_v43, %v3960_v35  ;;  %v785_v12 = vcombine.high %v3992_v28, %v3690_v0 }
 0x4e1   :  { %v653_v56 = vcombine.high %v569_v49, %v3690_v0  ;;  %v660_v57 = vrot.slane %v569_v49, %v3960_v35  ;;  %v3578_v49 = vld [vmem:[%s4708_s3 + $0x1c8] sm:$0xff]  }
 0x4e2   :  { %v601_v59 = vrot.slane %v587_v52, %v3960_v35  ;;  %v602_v60 = vcombine.low %v579_v51, %v594_v53  ;;  %v603_v61 = vcombine.high %v579_v51, %v594_v53  ;;  %v4002_v63 = vpop.permute.xlu1 %539  ;;  %v3579_v51 = vld [vmem:[%s4708_s3 + $0x110] sm:$0xff]   ;;  %3167 = vmatprep.subr.bf16.mxu0 %v3578_v49  ;;  %v799_v15 = vrot.slane %v785_v12, %v3960_v35 }
 0x4e3   :  { %v667_v3 = vrot.slane %v653_v56, %v3960_v35  ;;  %v668_v4 = vcombine.low %v645_v54, %v660_v57  ;;  %v669_v5 = vcombine.high %v645_v54, %v660_v57  ;;  %v566_v6 = vmul.f32 %v4002_v63, %v3951_v26  ;;  %v3581_v56 = vld [vmem:[%s4708_s3 + $0xd0] sm:$0xff]   ;;  %3159 = vmatprep.subr.bf16.mxu1 %v3579_v51 }
 0x4e4   :  { %v4017_v8 = vrot.slane %v602_v60, %v3980_v48  ;;  %v618_v9 = vcombine.low %v586_v55, %v601_v59  ;;  %v619_v10 = vcombine.high %v586_v55, %v601_v59  ;;  %v617_v20 = vrot.slane %v603_v61, %v3980_v48  ;;  %3160 = vmatpush3.bf16.msra.mxu1 %v3581_v56 }
 0x4e5   :  { %v4024_v13 = vrot.slane %v668_v4, %v3980_v48  ;;  %v684_v14 = vcombine.low %v652_v62, %v667_v3  ;;  %v685_v18 = vcombine.high %v652_v62, %v667_v3  ;;  %v4048_v46 = vrot.slane %v669_v5, %v3980_v48 }
 0x4e6   :  { %v4031_v19 = vpop.permute.xlu1 %558  ;;  %v633_v21 = vrot.slane %v619_v10, %v3980_v48  ;;  %v4036_v22 = vrot.slane %v618_v9, %v3980_v48  ;;  %v704_v27 = vcombine.high %v566_v6, %v3690_v0  ;;  %v711_v34 = vrot.slane %v566_v6, %v3960_v35  ;;  %v3584_v10 = vld [vmem:[%s4708_s3 + $0x248] sm:$0xff]  }
 0x4e7   :  { %v570_v29 = vmul.f32 %v4031_v19, %v3962_v36  ;;  %v4054_v33 = vrot.slane %v684_v14, %v3980_v48  ;;  %v634_v39 = vcombine.high %v4017_v8, %v3690_v0  ;;  %v700_v36 = vcombine.high %v4024_v13, %v3690_v0  ;;  %3189 = vmatprep.subr.bf16.mxu1 %v3584_v10 }
 0x4e8   :  { %v3410_v38 = vpack.i.bf16 %v617_v20, %v633_v21  ;;  %v636_v40 = vcombine.high %v4036_v22, %v3690_v0  ;;  %v637_v54 = vcombine.high %v633_v21, %v3690_v0  ;;  %v699_v55 = vrot.slane %v685_v18, %v3980_v48 }
 0x4e9   :  { %v719_v42 = vcombine.high %v570_v29, %v3690_v0  ;;  %v726_v43 = vrot.slane %v570_v29, %v3960_v35  ;;  %v702_v44 = vcombine.high %v4054_v33, %v3690_v0  ;;  %v718_v57 = vrot.slane %v704_v27, %v3960_v35 }
 0x4ea   :  { %v4073_v52 = vpop.permute.xlu1 %543  ;;  %3411 = vrot.lane.b32.xlu0 %v3410_v38, %s3694_s8  ;;  %v3415_v53 = vpack.i.bf16 %v634_v39, %v636_v40  ;;  %v792_v61 = vrot.slane %v3992_v28, %v3960_v35  ;;  %v635_v1 = vcombine.high %v617_v20, %v3690_v0  ;;  %v703_v2 = vcombine.high %v699_v55, %v3690_v0 }
 0x4eb   :  { %v733_v58 = vrot.slane %v719_v42, %v3960_v35  ;;  %v734_v59 = vcombine.low %v711_v34, %v726_v43  ;;  %v567_v60 = vmul.f32 %v4073_v52, %v3951_v26  ;;  %v3430_v62 = vpack.i.bf16 %v700_v36, %v702_v44 }
 0x4ec   :  { %3416 = vrot.lane.b32.xlu1 %v3415_v53, %s3693_s7  ;;  %v735_v3 = vcombine.high %v711_v34, %v726_v43  ;;  %v3420_v9 = vpack.i.bf16 %v635_v1, %v637_v54  ;;  %v701_v28 = vcombine.high %v4048_v46, %v3690_v0  ;;  %v970_v14 = vunpack.c.l.b16 %v965_v17 }
 0x4ed   :  { %v750_v4 = vcombine.low %v718_v57, %v733_v58  ;;  %v751_v5 = vcombine.high %v718_v57, %v733_v58  ;;  %v770_v6 = vcombine.high %v567_v60, %v3690_v0  ;;  %v777_v7 = vrot.slane %v567_v60, %v3960_v35 }
 0x4ee   :  { %3431 = vrot.lane.b32.xlu0 %v3430_v62, %s3693_s7  ;;  %v4100_v18 = vrot.slane %v734_v59, %v3980_v48  ;;  %v3435_v24 = vpack.i.bf16 %v701_v28, %v703_v2  ;;  %v969_v17 = vunpack.c.l.b16 %v964_v11  ;;  %v3425_v29 = vpack.i.bf16 %v4048_v46, %v699_v55 }
 0x4ef   :  { %v784_v20 = vrot.slane %v770_v6, %v3960_v35  ;;  %v4104_v21 = vrot.slane %v750_v4, %v3980_v48  ;;  %v800_v23 = vcombine.low %v777_v7, %v792_v61  ;;  %v765_v25 = vrot.slane %v751_v5, %v3980_v48 }
 0x4f0   :  { %3421 = vrot.lane.b32.xlu1 %v3420_v9, %s3695_s9  ;;  %v749_v34 = vrot.slane %v735_v3, %v3980_v48  ;;  %v801_v38 = vcombine.high %v777_v7, %v792_v61  ;;  %v4120_v42 = vsel %vm971_vm4, %v970_v14, %v969_v17  ;;  %v766_v46 = vcombine.high %v4100_v18, %v3690_v0 }
 0x4f1   :  { %v816_v12 = vcombine.low %v784_v20, %v799_v15  ;;  %v817_v27 = vcombine.high %v784_v20, %v799_v15  ;;  %v4114_v39 = vrot.slane %v800_v23, %v3980_v48  ;;  %v768_v40 = vcombine.high %v4104_v21, %v3690_v0 }
 0x4f2   :  { %3436 = vrot.lane.b32.xlu0 %v3435_v24, %s3695_s9  ;;  %v3440_v11 = vpack.i.bf16 %v749_v34, %v765_v25  ;;  %v815_v49 = vrot.slane %v801_v38, %v3980_v48  ;;  %v769_v53 = vcombine.high %v765_v25, %v3690_v0  ;;  %v767_v55 = vcombine.high %v749_v34, %v3690_v0  ;;  %v3582_v38 = vld [vmem:[%s4708_s3 + $0x1c0] sm:$0xff]  }
 0x4f3   :  { %v4123_v26 = vrot.slane %v816_v12, %v3980_v48  ;;  %v831_v43 = vrot.slane %v817_v27, %v3980_v48  ;;  %v832_v36 = vcombine.high %v4114_v39, %v3690_v0  ;;  %v3445_v51 = vpack.i.bf16 %v766_v46, %v768_v40 }
 0x4f4   :  { %3426 = vrot.lane.b32.xlu1 %v3425_v29, %s3694_s8  ;;  %v3450_v57 = vpack.i.bf16 %v767_v55, %v769_v53  ;;  %v833_v58 = vcombine.high %v815_v49, %v3690_v0  ;;  %v966_v61 = vpack.c.bf16 %v3880_v41, %v3880_v41 }
 0x4f5   :  { %v834_v44 = vcombine.high %v4123_v26, %v3690_v0  ;;  %v835_v56 = vcombine.high %v831_v43, %v3690_v0  ;;  %v3455_v60 = vpack.i.bf16 %v815_v49, %v831_v43 }
 0x4f6   :  { %3441 = vrot.lane.b32.xlu0 %v3440_v11, %s3694_s8 }
 0x4f7   :  { %v3460_v54 = vpack.i.bf16 %v832_v36, %v834_v44  ;;  %v3465_v59 = vpack.i.bf16 %v833_v58, %v835_v56  ;;  %v3586_v58 = vld [vmem:[%s4708_s3 + $0x1b8] sm:$0xff]  }
 0x4f8   :  { %3446 = vrot.lane.b32.xlu1 %v3445_v51, %s3693_s7 }
 0x4fa   :  { %3461 = vrot.lane.b32.xlu0 %v3460_v54, %s3693_s7 }
 0x4fc   :  { %3451 = vrot.lane.b32.xlu1 %v3450_v57, %s3695_s9  ;;  %v3585_v57 = vld [vmem:[%s4708_s3 + $0x208] sm:$0xff]  }
 0x4fe   :  { %3466 = vrot.lane.b32.xlu0 %v3465_v59, %s3695_s9 }
 0x500   :  { %3456 = vrot.lane.b32.xlu1 %v3455_v60, %s3694_s8  ;;  %v3588_v60 = vld [vmem:[%s4708_s3 + $0x240] sm:$0xff]  }
 0x504   :  { %975 = vrot.lane.b32.xlu1 %v966_v61, %s3693_s7 }
 0x55c   :  { %v3412_v62 = vpop.permute.xlu0 %3411 }
 0x55d   :  { %v3414_v7 = vunpack.i.h.bf16 %v3412_v62  ;;  %v3413_v9 = vunpack.i.l.bf16 %v3412_v62 }
 0x55e   :  { %v3417_v1 = vpop.permute.xlu1 %3416 }
 0x55f   :  { %v3419_v2 = vunpack.i.h.bf16 %v3417_v1  ;;  %v3418_v3 = vunpack.i.l.bf16 %v3417_v1 }
 0x560   :  { %v3432_v4 = vpop.permute.xlu0 %3431 }
 0x561   :  { %v932_v5 = vsel %vm214_vm2, %v4017_v8, %v3419_v2  ;;  %v935_v6 = vsel %vm214_vm2, %v4036_v22, %v3418_v3  ;;  %v3434_v15 = vunpack.i.h.bf16 %v3432_v4  ;;  %v3433_v41 = vunpack.i.l.bf16 %v3432_v4  ;;  %v3580_v22 = vld [vmem:[%s4708_s3 + $0x188] sm:$0xff]   ;;  %v3587_v2 = vld [vmem:[%s4708_s3 + $0x178] sm:$0xff]   ;;  %v3589_v4 = vld [vmem:[%s4708_s3 + $0x200] sm:$0xff]  }
 0x562   :  { %v3422_v28 = vpop.permute.xlu1 %3421  ;;  %v933_v20 = vsel %vm62_vm1, %v932_v5, %v3414_v7  ;;  %v936_v24 = vsel %vm62_vm1, %v935_v6, %v3413_v9  ;;  %v3592_v7 = vld [vmem:[%s4708_s3 + $0x238] sm:$0xff]  }
 0x563   :  { %v3424_v10 = vunpack.i.h.bf16 %v3422_v28  ;;  %v3423_v14 = vunpack.i.l.bf16 %v3422_v28  ;;  %v938_v40 = vsel %vm214_vm2, %v4024_v13, %v3434_v15  ;;  %v941_v11 = vsel %vm214_vm2, %v4054_v33, %v3433_v41  ;;  %v3583_v13 = vld [vmem:[%s4708_s3 + $0x180] sm:$0xff]   ;;  %v3591_v15 = vld [vmem:[%s4708_s3 + $0x170] sm:$0xff]  }
 0x564   :  { %v3437_v23 = vpop.permute.xlu0 %3436 }
 0x565   :  { %v934_v25 = vsel %vm365_vm3, %v933_v20, %v3424_v10  ;;  %v937_v17 = vsel %vm365_vm3, %v936_v24, %v3423_v14  ;;  %v3439_v46 = vunpack.i.h.bf16 %v3437_v23  ;;  %v3438_v43 = vunpack.i.l.bf16 %v3437_v23  ;;  %v3593_v20 = vld [vmem:[%s4708_s3 + $0x1f8] sm:$0xff]   ;;  %v3594_v23 = vld [vmem:[%s4708_s3 + $0x1a8] sm:$0xff]  }
 0x566   :  { %v956_v8 = vpack.c.bf16 %v934_v25, %v934_v25  ;;  %v3427_v12 = vpop.permute.xlu1 %3426  ;;  %v957_v27 = vpack.c.bf16 %v937_v17, %v937_v17  ;;  %v3596_v17 = vld [vmem:[%s4708_s3 + $0x230] sm:$0xff]  }
 0x567   :  { %v3429_v29 = vunpack.i.h.bf16 %v3427_v12  ;;  %v3428_v34 = vunpack.i.l.bf16 %v3427_v12  ;;  %v3595_v12 = vld [vmem:[%s4708_s3 + $0x168] sm:$0xff]  }
 0x568   :  { %v4165_v36 = vpop.permute.xlu0 %3441  ;;  %1563 = vmatprep.mubr.bf16.mxu0 %v957_v27 }
 0x569   :  { %v939_v44 = vsel %vm62_vm1, %v938_v40, %v3429_v29  ;;  %v942_v49 = vsel %vm62_vm1, %v941_v11, %v3428_v34  ;;  %1564 = vmatmul.mubr.bf16.vlgmr.msra.gmra.mxu0 %v956_v8  ;;  %v3443_v62 = vunpack.i.l.bf16 %v4165_v36  ;;  %v3598_v29 = vld [vmem:[%s4708_s3 + $0x1a0] sm:$0xff]   ;;  %v3600_v34 = vld [vmem:[%s4708_s3 + $0x228] sm:$0xff]   ;;  %v3602_v11 = vld [vmem:[%s4708_s3 + $0x198] sm:$0xff]  }
 0x56a   :  { %3168 = vmatpush3.bf16.msra.mxu0 %v3580_v22  ;;  %v4169_v51 = vpop.permute.xlu1 %3446  ;;  %v943_v53 = vsel %vm365_vm3, %v942_v49, %v3438_v43  ;;  %v940_v33 = vsel %vm365_vm3, %v939_v44, %v3439_v46  ;;  %v3597_v22 = vld [vmem:[%s4708_s3 + $0x1f0] sm:$0xff]   ;;  %v3601_v40 = vld [vmem:[%s4708_s3 + $0x1e8] sm:$0xff]   ;;  %v3604_v43 = vld [vmem:[%s4708_s3 + $0x220] sm:$0xff]  }
 0x56b   :  { %v3448_v54 = vunpack.i.l.bf16 %v4169_v51  ;;  %3169 = vmatprep.subr.bf16.mxu0 %v3582_v38  ;;  %v959_v55 = vpack.c.bf16 %v943_v53, %v943_v53  ;;  %v958_v56 = vpack.c.bf16 %v940_v33, %v940_v33  ;;  %v3599_v38 = vld [vmem:[%s4708_s3 + $0x160] sm:$0xff]   ;;  %v3449_v46 = vunpack.i.h.bf16 %v4169_v51  ;;  %v3603_v44 = vld [vmem:[%s4708_s3 + $0x158] sm:$0xff]   ;;  %v3606_v51 = vld [vmem:[%s4708_s3 + $0x190] sm:$0xff]  }
 0x56c   :  { %v4183_v59 = vpop.permute.xlu0 %3461  ;;  %v3605_v49 = vld [vmem:[%s4708_s3 + $0x1e0] sm:$0xff]   ;;  %v3608_v33 = vld [vmem:[%s4708_s3 + $0x218] sm:$0xff]  }
 0x56d   :  { %v947_v61 = vsel %vm214_vm2, %v4104_v21, %v3448_v54  ;;  %1603 = vmatprep.mubr.bf16.mxu1 %v959_v55  ;;  %v3590_v21 = vld [vmem:[%s4708_s3 + $0x1b0] sm:$0xff]   ;;  %v3463_v5 = vunpack.i.l.bf16 %v4183_v59  ;;  %v944_v53 = vsel %vm214_vm2, %v4100_v18, %v3449_v46  ;;  %v3444_v54 = vunpack.i.h.bf16 %v4165_v36  ;;  %v3609_v18 = vld [vmem:[%s4708_s3 + $0x1d8] sm:$0xff]  }
 0x56e   :  { %3170 = vmatpush3.bf16.msra.mxu0 %v3583_v13  ;;  %v4191_v1 = vpop.permute.xlu1 %3451  ;;  %1604 = vmatmul.mubr.bf16.vlgmr.msra.gmra.mxu1 %v958_v56  ;;  %v948_v6 = vsel %vm62_vm1, %v947_v61, %v3443_v62  ;;  %v3464_v55 = vunpack.i.h.bf16 %v4183_v59  ;;  %v3610_v36 = vld [vmem:[%s4708_s3 + $0x210] sm:$0xff]   ;;  %v3611_v62 = vld [vmem:[%s4708_s3 + $0x268] sm:$0xff]  }
 0x56f   :  { %v3453_v3 = vunpack.i.l.bf16 %v4191_v1  ;;  %3190 = vmatpush3.bf16.msra.mxu1 %v3585_v57  ;;  %3171 = vmatprep.subr.bf16.mxu0 %v3586_v58  ;;  %v953_v24 = vsel %vm214_vm2, %v4123_v26, %v3463_v5  ;;  %v3454_v13 = vunpack.i.h.bf16 %v4191_v1  ;;  %v3607_v57 = vld [vmem:[%s4708_s3 + $0x150] sm:$0xff]   ;;  %v945_v58 = vsel %vm62_vm1, %v944_v53, %v3444_v54  ;;  %v3614_v5 = vld [vmem:[%s4708_s3 + $0x258] sm:$0xff]  }
 0x570   :  { %3191 = vmatprep.subr.bf16.mxu1 %v3588_v60  ;;  %v4208_v9 = vpop.permute.xlu0 %3466  ;;  %v950_v59 = vsel %vm214_vm2, %v4114_v39, %v3464_v55 }
 0x571   :  { %v949_v28 = vsel %vm365_vm3, %v948_v6, %v3453_v3  ;;  %v3468_v25 = vunpack.i.l.bf16 %v4208_v9  ;;  %v946_v60 = vsel %vm365_vm3, %v945_v58, %v3454_v13  ;;  %v3612_v3 = vld [vmem:[%s4708_s3 + $0x1d0] sm:$0xff]   ;;  %v2960_v58 = vld [vmem:[%s4707_s4 + $0x38] ss:$0 sm:$0xff] }
 0x572   :  { %3172 = vmatpush3.bf16.msra.mxu0 %v3587_v2  ;;  %v3457_v10 = vpop.permute.xlu1 %3456  ;;  %v961_v14 = vpack.c.bf16 %v949_v28, %v949_v28  ;;  %v960_v1 = vpack.c.bf16 %v946_v60, %v946_v60  ;;  %v3469_v2 = vunpack.i.h.bf16 %v4208_v9  ;;  %v3615_v6 = vld [vmem:[%s4708_s3 + $0x250] sm:$0xff]   ;;  %v973_v9 = vpack.c.b16 %v4120_v42, %v4120_v42  ;;  %v3620_v42 = vld [vmem:[%s4708_s3 + $0x368] sm:$0xff]  }
 0x573   :  { %v3458_v41 = vunpack.i.l.bf16 %v3457_v10  ;;  %3192 = vmatpush3.bf16.msra.mxu1 %v3589_v4  ;;  %3173 = vmatprep.subr.bf16.mxu0 %v3590_v21  ;;  %v3459_v56 = vunpack.i.h.bf16 %v3457_v10  ;;  %v3613_v4 = vld [vmem:[%s4708_s3 + $0x260] sm:$0xff]   ;;  %v3616_v10 = vld [vmem:[%s4708_s3 + $0x2e8] sm:$0xff]  }
 0x574   :  { %1643 = vmatprep.mubr.bf16.mxu0 %v961_v14  ;;  %3193 = vmatprep.subr.bf16.mxu1 %v3592_v7  ;;  %v3617_v14 = vld [vmem:[%s4708_s3 + $0x2a8] sm:$0xff]  }
 0x575   :  { %v954_v8 = vsel %vm62_vm1, %v953_v24, %v3458_v41  ;;  %v951_v61 = vsel %vm62_vm1, %v950_v59, %v3459_v56  ;;  %v3621_v41 = vld [vmem:[%s4708_s3 + $0x328] sm:$0xff]   ;;  %v3622_v24 = vld [vmem:[%s4708_s3 + $0x2d8] sm:$0xff]  }
 0x576   :  { %3174 = vmatpush3.bf16.msra.mxu0 %v3591_v15  ;;  %v955_v27 = vsel %vm365_vm3, %v954_v8, %v3468_v25  ;;  %v952_v39 = vsel %vm365_vm3, %v951_v61, %v3469_v2  ;;  %v4307_v7 = vpop.permute.xlu1 %975  ;;  %v3618_v15 = vld [vmem:[%s4708_s3 + $0x2e0] sm:$0xff]   ;;  %v3623_v8 = vld [vmem:[%s4708_s3 + $0x298] sm:$0xff]  }
 0x577   :  { %3194 = vmatpush3.bf16.msra.mxu1 %v3593_v20  ;;  %3175 = vmatprep.subr.bf16.mxu0 %v3594_v23  ;;  %v963_v26 = vpack.c.bf16 %v955_v27, %v955_v27  ;;  %v962_v21 = vpack.c.bf16 %v952_v39, %v952_v39  ;;  %v979_v28 = vsel %vm214_vm2, %v973_v9, %v4307_v7  ;;  %v3624_v20 = vld [vmem:[%s4708_s3 + $0x360] sm:$0xff]   ;;  %v3629_v27 = vld [vmem:[%s4708_s3 + $0x318] sm:$0xff]  }
 0x578   :  { %3195 = vmatprep.subr.bf16.mxu1 %v3596_v17  ;;  %v3619_v23 = vld [vmem:[%s4708_s3 + $0x2a0] sm:$0xff]   ;;  %v3628_v17 = vld [vmem:[%s4708_s3 + $0x358] sm:$0xff]  }
 0x579   :  { %1683 = vmatprep.mubr.bf16.mxu1 %v963_v26  ;;  %v3625_v25 = vld [vmem:[%s4708_s3 + $0x320] sm:$0xff]   ;;  %v3632_v26 = vld [vmem:[%s4708_s3 + $0x350] sm:$0xff]  }
 0x57a   :  { %3176 = vmatpush3.bf16.msra.mxu0 %v3595_v12  ;;  %v3626_v12 = vld [vmem:[%s4708_s3 + $0x2d0] sm:$0xff]  }
 0x57b   :  { %3196 = vmatpush3.bf16.msra.mxu1 %v3597_v22  ;;  %3177 = vmatprep.subr.bf16.mxu0 %v3598_v29  ;;  %v3627_v22 = vld [vmem:[%s4708_s3 + $0x290] sm:$0xff]   ;;  %v3630_v29 = vld [vmem:[%s4708_s3 + $0x2c8] sm:$0xff]  }
 0x57c   :  { %3197 = vmatprep.subr.bf16.mxu1 %v3600_v34  ;;  %v3633_v34 = vld [vmem:[%s4708_s3 + $0x310] sm:$0xff]  }
 0x57e   :  { %3178 = vmatpush3.bf16.msra.mxu0 %v3599_v38  ;;  %v3631_v38 = vld [vmem:[%s4708_s3 + $0x288] sm:$0xff]  }
 0x57f   :  { %3198 = vmatpush3.bf16.msra.mxu1 %v3601_v40  ;;  %3179 = vmatprep.subr.bf16.mxu0 %v3602_v11  ;;  %v3634_v40 = vld [vmem:[%s4708_s3 + $0x2c0] sm:$0xff]  }
 0x580   :  { %3199 = vmatprep.subr.bf16.mxu1 %v3604_v43 }
 0x582   :  { %3180 = vmatpush3.bf16.msra.mxu0 %v3603_v44 }
 0x583   :  { %3200 = vmatpush3.bf16.msra.mxu1 %v3605_v49  ;;  %3181 = vmatprep.subr.bf16.mxu0 %v3606_v51 }
 0x584   :  { %3201 = vmatprep.subr.bf16.mxu1 %v3608_v33 }
 0x586   :  { %3182 = vmatpush3.bf16.msra.mxu0 %v3607_v57 }
 0x587   :  { %3202 = vmatpush3.bf16.msra.mxu1 %v3609_v18  ;;  %3365 = vmatprep.subr.bf16.mxu0 %v3690_v0 }
 0x588   :  { %3203 = vmatprep.subr.bf16.mxu1 %v3610_v36 }
 0x589   :  { %1644 = vmatmul.mubr.bf16.vlgmr.msra.gmra.mxu0 %v960_v1 }
 0x58a   :  { %3366 = vmatpush3.bf16.msra.mxu0 %v3611_v62  ;;  %3373 = vmatprep.mubr.msk.bf16.mxu0 %vm3691_vm0, %v3690_v0 }
 0x58b   :  { %3204 = vmatpush3.bf16.msra.mxu1 %v3612_v3  ;;  %3367 = vmatprep.subr.bf16.mxu0 %v3690_v0 }
 0x58c   :  { %3216 = vmatprep.subr.bf16.mxu1 %v3616_v10 }
 0x58e   :  { %1684 = vmatmul.mubr.bf16.vlgmr.msra.gmra.mxu1 %v962_v21  ;;  %3368 = vmatpush3.bf16.msra.mxu0 %v3613_v4 }
 0x58f   :  { %3369 = vmatprep.subr.bf16.mxu0 %v3690_v0  ;;  %3217 = vmatpush3.bf16.msra.mxu1 %v3617_v14 }
 0x590   :  { %3218 = vmatprep.subr.bf16.mxu1 %v3618_v15 }
 0x592   :  { %3370 = vmatpush3.bf16.msra.mxu0 %v3614_v5 }
 0x593   :  { %3371 = vmatprep.subr.bf16.mxu0 %v3690_v0  ;;  %3219 = vmatpush3.bf16.msra.mxu1 %v3619_v23 }
 0x594   :  { %3220 = vmatprep.subr.bf16.mxu1 %v3622_v24 }
 0x596   :  { %3372 = vmatpush3.bf16.msra.mxu0 %v3615_v6 }
 0x597   :  { %3238 = vmatprep.subr.bf16.mxu0 %v3620_v42  ;;  %3221 = vmatpush3.bf16.msra.mxu1 %v3623_v8  ;;  %v3636_v8 = vld [vmem:[%s4708_s3 + $0x348] sm:$0xff]  }
 0x598   :  { %3222 = vmatprep.subr.bf16.mxu1 %v3626_v12 }
 0x599   :  { %3374 = vmatmul.mubr.msk.bf16.vlgmr.msra.gmra.mxu0 %vm62_vm1, %v979_v28 }
 0x59a   :  { %3239 = vmatpush3.bf16.msra.mxu0 %v3621_v41 }
 0x59b   :  { %3240 = vmatprep.subr.bf16.mxu0 %v3624_v20  ;;  %3223 = vmatpush3.bf16.msra.mxu1 %v3627_v22 }
 0x59c   :  { %3224 = vmatprep.subr.bf16.mxu1 %v3630_v29 }
 0x59e   :  { %3241 = vmatpush3.bf16.msra.mxu0 %v3625_v25 }
 0x59f   :  { %3242 = vmatprep.subr.bf16.mxu0 %v3628_v17  ;;  %3225 = vmatpush3.bf16.msra.mxu1 %v3631_v38  ;;  %v3635_v17 = vld [vmem:[%s4708_s3 + $0x280] sm:$0xff]  }
 0x5a0   :  { %3226 = vmatprep.subr.bf16.mxu1 %v3634_v40 }
 0x5a2   :  { %3243 = vmatpush3.bf16.msra.mxu0 %v3629_v27 }
 0x5a3   :  { %3244 = vmatprep.subr.bf16.mxu0 %v3632_v26  ;;  %3227 = vmatpush3.bf16.msra.mxu1 %v3635_v17 }
 0x5a6   :  { %3245 = vmatpush3.bf16.msra.mxu0 %v3633_v34 }
 0x5a7   :  { %3246 = vmatprep.subr.bf16.mxu0 %v3636_v8 }
 0x629   :  { %v3139_v11 = vpop.f32.mrf.mxu0 }
 0x62b   :  { %v3140_v46 = vpop.f32.mrf.mxu0 }
 0x62c   :  { %v3141_v56 = vadd.f32 %v3140_v46, %v3139_v11  ;;  %v3638_v11 = vld [vmem:[%s4708_s3 + $0x2b8] sm:$0xff]  }
 0x62d   :  { %v3142_v43 = vpop.f32.mrf.mxu0  ;;  %3228 = vmatprep.subr.bf16.mxu1 %v3638_v11 }
 0x62e   :  { %v3161_v44 = vpop.f32.mrf.mxu1  ;;  %v1566_v59 = vadd.f32 %v3141_v56, %v2960_v58 }
 0x62f   :  { %v3143_v49 = vpop.f32.mrf.mxu0 }
 0x630   :  { %v3162_v51 = vpop.f32.mrf.mxu1 }
 0x631   :  { %v3163_v60 = vadd.f32 %v3162_v51, %v3161_v44 }
 0x632   :  { %v3164_v53 = vpop.f32.mrf.mxu1 }
 0x633   :  { %v1606_v1 = vadd.f32 %v3163_v60, %v1566_v59  ;;  %v3639_v53 = vld [vmem:[%s4708_s3 + $0x278] sm:$0xff]  }
 0x634   :  { %v3165_v13 = vpop.f32.mrf.mxu1  ;;  %3229 = vmatpush3.bf16.msra.mxu1 %v3639_v53 }
 0x635   :  { %v3641_v13 = vld [vmem:[%s4708_s3 + $0x300] sm:$0xff]  }
 0x649   :  { %v3183_v33 = vpop.f32.mrf.mxu0 }
 0x64b   :  { %v3184_v54 = vpop.f32.mrf.mxu0 }
 0x64c   :  { %v3185_v61 = vadd.f32 %v3184_v54, %v3183_v33 }
 0x64d   :  { %v3186_v55 = vpop.f32.mrf.mxu0 }
 0x64e   :  { %v3205_v57 = vpop.f32.mrf.mxu1  ;;  %v1646_v39 = vadd.f32 %v3185_v61, %v1606_v1  ;;  %v3642_v1 = vld [vmem:[%s4708_s3 + $0x2b0] sm:$0xff]  }
 0x64f   :  { %v3187_v18 = vpop.f32.mrf.mxu0  ;;  %3230 = vmatprep.subr.bf16.mxu1 %v3642_v1 }
 0x650   :  { %v3206_v36 = vpop.f32.mrf.mxu1 }
 0x651   :  { %v3207_v2 = vadd.f32 %v3206_v36, %v3205_v57 }
 0x652   :  { %v3208_v62 = vpop.f32.mrf.mxu1 }
 0x653   :  { %v1686_v4 = vadd.f32 %v3207_v2, %v1646_v39  ;;  %v3643_v2 = vld [vmem:[%s4708_s3 + $0x270] sm:$0xff]  }
 0x654   :  { %v3209_v3 = vpop.f32.mrf.mxu1  ;;  %3231 = vmatpush3.bf16.msra.mxu1 %v3643_v2 }
 0x659   :  { %v1725_v21 = vpop.f32.mrf.mxu0 }
 0x65a   :  { %v1726_v5 = vadd.f32 %v1725_v21, %v1686_v4 }
 0x65b   :  { %v3375_v6 = vpop.f32.mrf.mxu0 }
 0x65c   :  { %3688 = vtanh.f32 %v1726_v5  ;;  %v3644_v5 = vld [vmem:[%s4708_s3 + $0x338] sm:$0xff]  }
 0x65d   :  { %v1728_v9 = vpop.f32.mrf.mxu0 }
 0x65f   :  { %v3376_v28 = vpop.f32.mrf.mxu0 }
 0x669   :  { %v4374_v10 = vpop.eup %3688 }
 0x66a   :  { %v1739_v14 = vrot.slane %v4374_v10, %v3805_v30 }
 0x66c   :  { %v1740_v15 = vcombine.high %v1739_v14, %v1739_v14  ;;  %v1747_v42 = vrot.slane %v1739_v14, %v3805_v30 }
 0x66e   :  { %v1754_v41 = vrot.slane %v1740_v15, %v3805_v30  ;;  %v1758_v20 = vrot.slane %v1747_v42, %v3818_v37  ;;  %v3637_v30 = vld [vmem:[%s4708_s3 + $0x308] sm:$0xff]  }
 0x66f   :  { %3247 = vmatpush3.bf16.msra.mxu0 %v3637_v30 }
 0x670   :  { %v4382_v23 = vrot.slane %v1754_v41, %v3818_v37  ;;  %v1765_v24 = vmul.f32 %v1758_v20, %v3947_v16  ;;  %v1766_v25 = vmul.f32 %v1758_v20, %v3955_v31  ;;  %v1767_v40 = vmul.f32 %v1758_v20, %v4002_v63  ;;  %v3640_v63 = vld [vmem:[%s4708_s3 + $0x340] sm:$0xff]   ;;  %v3645_v41 = vld [vmem:[%s4708_s3 + $0x2f8] sm:$0xff]  }
 0x671   :  { %3248 = vmatprep.subr.bf16.mxu0 %v3640_v63  ;;  %v1768_v21 = vmul.f32 %v1758_v20, %v4073_v52  ;;  %v3646_v20 = vld [vmem:[%s4708_s3 + $0x3e8] sm:$0xff]  }
 0x672   :  { %v1769_v37 = vmul.f32 %v4382_v23, %v3949_v45  ;;  %v1773_v12 = vcombine.high %v1765_v24, %v3690_v0  ;;  %v1770_v16 = vmul.f32 %v4382_v23, %v3977_v47  ;;  %v1780_v31 = vrot.slane %v1765_v24, %v3960_v35  ;;  %3260 = vmatprep.subr.bf16.mxu1 %v3646_v20 }
 0x673   :  { %v1839_v27 = vcombine.high %v1766_v25, %v3690_v0  ;;  %v1771_v34 = vmul.f32 %v4382_v23, %v4031_v19  ;;  %v1846_v38 = vrot.slane %v1766_v25, %v3960_v35  ;;  %v1905_v60 = vcombine.high %v1767_v40, %v3690_v0  ;;  %3249 = vmatpush3.bf16.msra.mxu0 %v3641_v13 }
 0x674   :  { %v1788_v26 = vcombine.high %v1769_v37, %v3690_v0  ;;  %v1795_v22 = vrot.slane %v1769_v37, %v3960_v35  ;;  %v1854_v29 = vcombine.high %v1770_v16, %v3690_v0  ;;  %v1787_v45 = vrot.slane %v1773_v12, %v3960_v35  ;;  %3250 = vmatprep.subr.bf16.mxu0 %v3644_v5 }
 0x675   :  { %v1861_v47 = vrot.slane %v1770_v16, %v3960_v35  ;;  %v1853_v49 = vrot.slane %v1839_v27, %v3960_v35  ;;  %v1920_v56 = vcombine.high %v1771_v34, %v3690_v0  ;;  %v1927_v4 = vrot.slane %v1771_v34, %v3960_v35 }
 0x676   :  { %v1802_v46 = vrot.slane %v1788_v26, %v3960_v35  ;;  %v1804_v43 = vcombine.high %v1780_v31, %v1795_v22  ;;  %v1803_v44 = vcombine.low %v1780_v31, %v1795_v22  ;;  %v1868_v19 = vrot.slane %v1854_v29, %v3960_v35  ;;  %v3647_v31 = vld [vmem:[%s4708_s3 + $0x330] sm:$0xff]  }
 0x677   :  { %v1869_v51 = vcombine.low %v1846_v38, %v1861_v47  ;;  %v1870_v58 = vcombine.high %v1846_v38, %v1861_v47  ;;  %v1934_v14 = vrot.slane %v1920_v56, %v3960_v35  ;;  %v1919_v42 = vrot.slane %v1905_v60, %v3960_v35  ;;  %3251 = vmatpush3.bf16.msra.mxu0 %v3645_v41  ;;  %v3649_v47 = vld [vmem:[%s4708_s3 + $0x2f0] sm:$0xff]  }
 0x678   :  { %v1820_v33 = vcombine.high %v1787_v45, %v1802_v46  ;;  %v4427_v54 = vrot.slane %v1803_v44, %v3980_v48  ;;  %v1819_v55 = vcombine.low %v1787_v45, %v1802_v46  ;;  %v1885_v57 = vcombine.low %v1853_v49, %v1868_v19  ;;  %3252 = vmatprep.subr.bf16.mxu0 %v3647_v31 }
 0x679   :  { %v1886_v18 = vcombine.high %v1853_v49, %v1868_v19  ;;  %v1818_v36 = vrot.slane %v1804_v43, %v3980_v48  ;;  %v4437_v62 = vrot.slane %v1869_v51, %v3980_v48  ;;  %v1884_v52 = vrot.slane %v1870_v58, %v3980_v48  ;;  %v3652_v43 = vld [vmem:[%s4708_s3 + $0x468] sm:$0xff]  }
 0x67a   :  { %v1834_v59 = vrot.slane %v1820_v33, %v3980_v48  ;;  %v4434_v61 = vrot.slane %v1819_v55, %v3980_v48  ;;  %v4446_v3 = vrot.slane %v1885_v57, %v3980_v48  ;;  %v1835_v9 = vcombine.high %v4427_v54, %v3690_v0 }
 0x67b   :  { %v1900_v39 = vrot.slane %v1886_v18, %v3980_v48  ;;  %v1901_v25 = vcombine.high %v4437_v62, %v3690_v0  ;;  %v1912_v8 = vrot.slane %v1767_v40, %v3960_v35  ;;  %v1836_v30 = vcombine.high %v1818_v36, %v3690_v0  ;;  %3253 = vmatpush3.bf16.msra.mxu0 %v3649_v47 }
 0x67c   :  { %v3470_v6 = vpack.i.bf16 %v1818_v36, %v1834_v59  ;;  %v1837_v28 = vcombine.high %v4434_v61, %v3690_v0  ;;  %v1903_v15 = vcombine.high %v4446_v3, %v3690_v0  ;;  %v1838_v17 = vcombine.high %v1834_v59, %v3690_v0  ;;  %3282 = vmatprep.subr.bf16.mxu0 %v3652_v43 }
 0x67d   :  { %v1904_v37 = vcombine.high %v1900_v39, %v3690_v0  ;;  %v1952_v12 = vcombine.high %v1919_v42, %v1934_v14  ;;  %v1951_v16 = vcombine.low %v1919_v42, %v1934_v14  ;;  %v1935_v26 = vcombine.low %v1912_v8, %v1927_v4 }
 0x67e   :  { %3471 = vrot.lane.b32.xlu1 %v3470_v6, %s3694_s8  ;;  %v3475_v24 = vpack.i.bf16 %v1835_v9, %v1837_v28  ;;  %v3490_v27 = vpack.i.bf16 %v1901_v25, %v1903_v15  ;;  %v1772_v22 = vmul.f32 %v4382_v23, %v3984_v50  ;;  %v1971_v29 = vcombine.high %v1768_v21, %v3690_v0 }
 0x67f   :  { %v1902_v34 = vcombine.high %v1884_v52, %v3690_v0  ;;  %v1936_v45 = vcombine.high %v1912_v8, %v1927_v4  ;;  %v4485_v38 = vrot.slane %v1951_v16, %v3980_v48  ;;  %v3480_v40 = vpack.i.bf16 %v1836_v30, %v1838_v17 }
 0x680   :  { %3476 = vrot.lane.b32.xlu0 %v3475_v24, %s3693_s7  ;;  %v1986_v11 = vcombine.high %v1772_v22, %v3690_v0  ;;  %v1978_v23 = vrot.slane %v1768_v21, %v3960_v35  ;;  %v1993_v46 = vrot.slane %v1772_v22, %v3960_v35  ;;  %v1966_v44 = vrot.slane %v1952_v12, %v3980_v48 }
 0x681   :  { %v3495_v50 = vpack.i.bf16 %v1902_v34, %v1904_v37  ;;  %v4500_v19 = vrot.slane %v1935_v26, %v3980_v48  ;;  %v1985_v49 = vrot.slane %v1971_v29, %v3960_v35  ;;  %v3485_v53 = vpack.i.bf16 %v1884_v52, %v1900_v39 }
 0x682   :  { %3491 = vrot.lane.b32.xlu1 %v3490_v27, %s3693_s7  ;;  %v2000_v51 = vrot.slane %v1986_v11, %v3960_v35  ;;  %v1950_v63 = vrot.slane %v1936_v45, %v3980_v48  ;;  %v1969_v13 = vcombine.high %v4485_v38, %v3690_v0  ;;  %v2001_v33 = vcombine.low %v1978_v23, %v1993_v46 }
 0x683   :  { %v2002_v56 = vcombine.high %v1978_v23, %v1993_v46  ;;  %v1967_v18 = vcombine.high %v4500_v19, %v3690_v0  ;;  %v1970_v59 = vcombine.high %v1966_v44, %v3690_v0 }
 0x684   :  { %3481 = vrot.lane.b32.xlu0 %v3480_v40, %s3695_s9  ;;  %v2017_v55 = vcombine.low %v1985_v49, %v2000_v51  ;;  %v2018_v57 = vcombine.high %v1985_v49, %v2000_v51  ;;  %v4509_v58 = vrot.slane %v2001_v33, %v3980_v48  ;;  %v3500_v35 = vpack.i.bf16 %v1950_v63, %v1966_v44 }
 0x685   :  { %v3505_v1 = vpack.i.bf16 %v1967_v18, %v1969_v13  ;;  %v2016_v4 = vrot.slane %v2002_v56, %v3980_v48  ;;  %v1968_v5 = vcombine.high %v1950_v63, %v3690_v0 }
 0x686   :  { %3496 = vrot.lane.b32.xlu1 %v3495_v50, %s3695_s9  ;;  %v4515_v60 = vrot.slane %v2017_v55, %v3980_v48  ;;  %v2032_v36 = vrot.slane %v2018_v57, %v3980_v48  ;;  %v2033_v2 = vcombine.high %v4509_v58, %v3690_v0  ;;  %v3650_v50 = vld [vmem:[%s4708_s3 + $0x3e0] sm:$0xff]   ;;  %v3653_v57 = vld [vmem:[%s4708_s3 + $0x428] sm:$0xff]  }
 0x687   :  { %v3510_v9 = vpack.i.bf16 %v1968_v5, %v1970_v59  ;;  %v2034_v28 = vcombine.high %v2016_v4, %v3690_v0 }
 0x688   :  { %3486 = vrot.lane.b32.xlu0 %v3485_v53, %s3694_s8  ;;  %v2035_v39 = vcombine.high %v4515_v60, %v3690_v0  ;;  %v2036_v6 = vcombine.high %v2032_v36, %v3690_v0  ;;  %v3515_v15 = vpack.i.bf16 %v2016_v4, %v2032_v36  ;;  %v3656_v36 = vld [vmem:[%s4708_s3 + $0x460] sm:$0xff]  }
 0x68a   :  { %3501 = vrot.lane.b32.xlu1 %v3500_v35, %s3694_s8  ;;  %v3520_v21 = vpack.i.bf16 %v2033_v2, %v2035_v39  ;;  %v3525_v14 = vpack.i.bf16 %v2034_v28, %v2036_v6  ;;  %v3654_v35 = vld [vmem:[%s4708_s3 + $0x3d8] sm:$0xff]  }
 0x68b   :  { %v3655_v39 = vld [vmem:[%s4708_s3 + $0x398] sm:$0xff]  }
 0x68c   :  { %3506 = vrot.lane.b32.xlu0 %v3505_v1, %s3693_s7 }
 0x68e   :  { %3521 = vrot.lane.b32.xlu1 %v3520_v21, %s3693_s7  ;;  %v3657_v21 = vld [vmem:[%s4708_s3 + $0x420] sm:$0xff]  }
 0x690   :  { %3511 = vrot.lane.b32.xlu0 %v3510_v9, %s3695_s9  ;;  %v3660_v9 = vld [vmem:[%s4708_s3 + $0x458] sm:$0xff]  }
 0x692   :  { %3526 = vrot.lane.b32.xlu1 %v3525_v14, %s3695_s9 }
 0x694   :  { %3516 = vrot.lane.b32.xlu0 %v3515_v15, %s3694_s8 }
 0x6f0   :  { %v3472_v48 = vpop.permute.xlu1 %3471 }
 0x6f1   :  { %v3474_v17 = vunpack.i.h.bf16 %v3472_v48  ;;  %v3473_v8 = vunpack.i.l.bf16 %v3472_v48 }
 0x6f2   :  { %v3477_v52 = vpop.permute.xlu0 %3476 }
 0x6f3   :  { %v3479_v42 = vunpack.i.h.bf16 %v3477_v52  ;;  %v3478_v41 = vunpack.i.l.bf16 %v3477_v52  ;;  %v3659_v52 = vld [vmem:[%s4708_s3 + $0x390] sm:$0xff]  }
 0x6f4   :  { %v3492_v20 = vpop.permute.xlu1 %3491 }
 0x6f5   :  { %v2133_v24 = vsel %vm214_vm2, %v4427_v54, %v3479_v42  ;;  %v2136_v25 = vsel %vm214_vm2, %v4434_v61, %v3478_v41  ;;  %v3494_v16 = vunpack.i.h.bf16 %v3492_v20  ;;  %v3493_v31 = vunpack.i.l.bf16 %v3492_v20  ;;  %v3648_v61 = vld [vmem:[%s4708_s3 + $0x3a8] sm:$0xff]   ;;  %v3661_v41 = vld [vmem:[%s4708_s3 + $0x418] sm:$0xff]  }
 0x6f6   :  { %v3482_v30 = vpop.permute.xlu0 %3481  ;;  %v2134_v27 = vsel %vm62_vm1, %v2133_v24, %v3474_v17  ;;  %v2137_v22 = vsel %vm62_vm1, %v2136_v25, %v3473_v8  ;;  %v3662_v20 = vld [vmem:[%s4708_s3 + $0x3c8] sm:$0xff]   ;;  %v3664_v17 = vld [vmem:[%s4708_s3 + $0x450] sm:$0xff]  }
 0x6f7   :  { %v3484_v37 = vunpack.i.h.bf16 %v3482_v30  ;;  %v3483_v12 = vunpack.i.l.bf16 %v3482_v30  ;;  %v2139_v23 = vsel %vm214_vm2, %v4437_v62, %v3494_v16  ;;  %v2142_v46 = vsel %vm214_vm2, %v4446_v3, %v3493_v31  ;;  %v3651_v62 = vld [vmem:[%s4708_s3 + $0x3a0] sm:$0xff]   ;;  %v3663_v30 = vld [vmem:[%s4708_s3 + $0x388] sm:$0xff]  }
 0x6f8   :  { %v3497_v26 = vpop.permute.xlu1 %3496  ;;  %v3666_v16 = vld [vmem:[%s4708_s3 + $0x3c0] sm:$0xff]   ;;  %v3668_v31 = vld [vmem:[%s4708_s3 + $0x448] sm:$0xff]  }
 0x6f9   :  { %v2135_v29 = vsel %vm365_vm3, %v2134_v27, %v3484_v37  ;;  %v2138_v34 = vsel %vm365_vm3, %v2137_v22, %v3483_v12  ;;  %v3499_v43 = vunpack.i.h.bf16 %v3497_v26  ;;  %v3498_v44 = vunpack.i.l.bf16 %v3497_v26  ;;  %v3665_v12 = vld [vmem:[%s4708_s3 + $0x410] sm:$0xff]   ;;  %v3667_v27 = vld [vmem:[%s4708_s3 + $0x380] sm:$0xff]   ;;  %v3669_v26 = vld [vmem:[%s4708_s3 + $0x408] sm:$0xff]  }
 0x6fa   :  { %v2157_v54 = vpack.c.bf16 %v2135_v29, %v2135_v29  ;;  %v3487_v45 = vpop.permute.xlu0 %3486  ;;  %v2158_v47 = vpack.c.bf16 %v2138_v34, %v2138_v34  ;;  %v3670_v22 = vld [vmem:[%s4708_s3 + $0x3b8] sm:$0xff]   ;;  %v3672_v34 = vld [vmem:[%s4708_s3 + $0x440] sm:$0xff]  }
 0x6fb   :  { %v3489_v40 = vunpack.i.h.bf16 %v3487_v45  ;;  %v3488_v11 = vunpack.i.l.bf16 %v3487_v45  ;;  %v3673_v45 = vld [vmem:[%s4708_s3 + $0x400] sm:$0xff]  }
 0x6fc   :  { %v4551_v49 = vpop.permute.xlu1 %3501  ;;  %2751 = vmatprep.mubr.bf16.mxu1 %v2158_v47  ;;  %v3674_v47 = vld [vmem:[%s4708_s3 + $0x3b0] sm:$0xff]  }
 0x6fd   :  { %v2140_v51 = vsel %vm62_vm1, %v2139_v23, %v3489_v40  ;;  %v2143_v53 = vsel %vm62_vm1, %v2142_v46, %v3488_v11  ;;  %2752 = vmatmul.mubr.bf16.vlgmr.msra.gmra.mxu1 %v2157_v54  ;;  %v3503_v1 = vunpack.i.l.bf16 %v4551_v49  ;;  %v3671_v54 = vld [vmem:[%s4708_s3 + $0x378] sm:$0xff]  }
 0x6fe   :  { %3261 = vmatpush3.bf16.msra.mxu1 %v3648_v61  ;;  %v4555_v63 = vpop.permute.xlu0 %3506  ;;  %v2144_v13 = vsel %vm365_vm3, %v2143_v53, %v3498_v44  ;;  %v2141_v3 = vsel %vm365_vm3, %v2140_v51, %v3499_v43  ;;  %v3676_v11 = vld [vmem:[%s4708_s3 + $0x438] sm:$0xff]   ;;  %v3675_v43 = vld [vmem:[%s4708_s3 + $0x370] sm:$0xff]  }
 0x6ff   :  { %v3508_v33 = vunpack.i.l.bf16 %v4555_v63  ;;  %3262 = vmatprep.subr.bf16.mxu1 %v3650_v50  ;;  %v2160_v55 = vpack.c.bf16 %v2144_v13, %v2144_v13  ;;  %v2159_v56 = vpack.c.bf16 %v2141_v3, %v2141_v3  ;;  %v3509_v29 = vunpack.i.h.bf16 %v4555_v63  ;;  %v3679_v13 = vld [vmem:[%s4708_s3 + $0x488] sm:$0xff]  }
 0x700   :  { %v4569_v18 = vpop.permute.xlu1 %3521  ;;  %v3504_v50 = vunpack.i.h.bf16 %v4551_v49  ;;  %v3678_v49 = vld [vmem:[%s4708_s3 + $0x430] sm:$0xff]  }
 0x701   :  { %v2148_v59 = vsel %vm214_vm2, %v4485_v38, %v3508_v33  ;;  %2791 = vmatprep.mubr.bf16.mxu0 %v2160_v55  ;;  %v3658_v38 = vld [vmem:[%s4708_s3 + $0x3d0] sm:$0xff]   ;;  %v3523_v5 = vunpack.i.l.bf16 %v4569_v18  ;;  %v2145_v61 = vsel %vm214_vm2, %v4500_v19, %v3509_v29  ;;  %v3524_v23 = vunpack.i.h.bf16 %v4569_v18  ;;  %v3677_v19 = vld [vmem:[%s4708_s3 + $0x3f8] sm:$0xff]   ;;  %v3681_v55 = vld [vmem:[%s4708_s3 + $0x480] sm:$0xff]  }
 0x702   :  { %3263 = vmatpush3.bf16.msra.mxu1 %v3651_v62  ;;  %v4577_v2 = vpop.permute.xlu0 %3511  ;;  %2792 = vmatmul.mubr.bf16.vlgmr.msra.gmra.mxu0 %v2159_v56  ;;  %v2149_v6 = vsel %vm62_vm1, %v2148_v59, %v3503_v1  ;;  %v2146_v44 = vsel %vm62_vm1, %v2145_v61, %v3504_v50  ;;  %v3680_v33 = vld [vmem:[%s4708_s3 + $0x3f0] sm:$0xff]   ;;  %v2165_v18 = vpack.c.bf16 %v4374_v10, %v4374_v10  ;;  %v3030_v10 = vld [vmem:[%s4707_s4 + $0x40] ss:$0 sm:$0xff] }
 0x703   :  { %v3513_v4 = vunpack.i.l.bf16 %v4577_v2  ;;  %3283 = vmatpush3.bf16.msra.mxu0 %v3653_v57  ;;  %3264 = vmatprep.subr.bf16.mxu1 %v3654_v35  ;;  %v2154_v24 = vsel %vm214_vm2, %v4515_v60, %v3523_v5  ;;  %v3514_v40 = vunpack.i.h.bf16 %v4577_v2  ;;  %v2151_v53 = vsel %vm214_vm2, %v4509_v58, %v3524_v23  ;;  %v3682_v57 = vld [vmem:[%s4708_s3 + $0x478] sm:$0xff]   ;;  %v3683_v35 = vld [vmem:[%s4708_s3 + $0x470] sm:$0xff]  }
 0x704   :  { %3284 = vmatprep.subr.bf16.mxu0 %v3656_v36  ;;  %v4594_v28 = vpop.permute.xlu1 %3526  ;;  %v2167_v36 = vsel %vm214_vm2, %v2165_v18, %v4307_v7 }
 0x705   :  { %v2150_v14 = vsel %vm365_vm3, %v2149_v6, %v3513_v4  ;;  %v3528_v25 = vunpack.i.l.bf16 %v4594_v28  ;;  %v2147_v51 = vsel %vm365_vm3, %v2146_v44, %v3514_v40  ;;  %v3529_v3 = vunpack.i.h.bf16 %v4594_v28 }
 0x706   :  { %3265 = vmatpush3.bf16.msra.mxu1 %v3655_v39  ;;  %v3517_v15 = vpop.permute.xlu0 %3516  ;;  %v2162_v48 = vpack.c.bf16 %v2150_v14, %v2150_v14  ;;  %v2161_v62 = vpack.c.bf16 %v2147_v51, %v2147_v51 }
 0x707   :  { %v3518_v42 = vunpack.i.l.bf16 %v3517_v15  ;;  %3285 = vmatpush3.bf16.msra.mxu0 %v3657_v21  ;;  %3266 = vmatprep.subr.bf16.mxu1 %v3658_v38  ;;  %v3519_v46 = vunpack.i.h.bf16 %v3517_v15 }
 0x708   :  { %2831 = vmatprep.mubr.bf16.mxu1 %v2162_v48  ;;  %3286 = vmatprep.subr.bf16.mxu0 %v3660_v9 }
 0x709   :  { %v2155_v8 = vsel %vm62_vm1, %v2154_v24, %v3518_v42  ;;  %v2152_v63 = vsel %vm62_vm1, %v2151_v53, %v3519_v46 }
 0x70a   :  { %3267 = vmatpush3.bf16.msra.mxu1 %v3659_v52  ;;  %v2156_v37 = vsel %vm365_vm3, %v2155_v8, %v3528_v25  ;;  %v2153_v58 = vsel %vm365_vm3, %v2152_v63, %v3529_v3 }
 0x70b   :  { %3287 = vmatpush3.bf16.msra.mxu0 %v3661_v41  ;;  %3268 = vmatprep.subr.bf16.mxu1 %v3662_v20  ;;  %v2164_v60 = vpack.c.bf16 %v2156_v37, %v2156_v37  ;;  %v2163_v56 = vpack.c.bf16 %v2153_v58, %v2153_v58 }
 0x70c   :  { %3288 = vmatprep.subr.bf16.mxu0 %v3664_v17 }
 0x70d   :  { %2871 = vmatprep.mubr.bf16.mxu0 %v2164_v60 }
 0x70e   :  { %3269 = vmatpush3.bf16.msra.mxu1 %v3663_v30 }
 0x70f   :  { %3289 = vmatpush3.bf16.msra.mxu0 %v3665_v12  ;;  %3270 = vmatprep.subr.bf16.mxu1 %v3666_v16 }
 0x710   :  { %3290 = vmatprep.subr.bf16.mxu0 %v3668_v31 }
 0x712   :  { %3271 = vmatpush3.bf16.msra.mxu1 %v3667_v27 }
 0x713   :  { %3291 = vmatpush3.bf16.msra.mxu0 %v3669_v26  ;;  %3272 = vmatprep.subr.bf16.mxu1 %v3670_v22 }
 0x714   :  { %3292 = vmatprep.subr.bf16.mxu0 %v3672_v34 }
 0x716   :  { %3273 = vmatpush3.bf16.msra.mxu1 %v3671_v54 }
 0x717   :  { %3293 = vmatpush3.bf16.msra.mxu0 %v3673_v45  ;;  %3274 = vmatprep.subr.bf16.mxu1 %v3674_v47 }
 0x718   :  { %3294 = vmatprep.subr.bf16.mxu0 %v3676_v11 }
 0x71a   :  { %3275 = vmatpush3.bf16.msra.mxu1 %v3675_v43 }
 0x71b   :  { %3295 = vmatpush3.bf16.msra.mxu0 %v3677_v19  ;;  %3377 = vmatprep.subr.bf16.mxu1 %v3690_v0 }
 0x71c   :  { %3296 = vmatprep.subr.bf16.mxu0 %v3678_v49 }
 0x71d   :  { %2832 = vmatmul.mubr.bf16.vlgmr.msra.gmra.mxu1 %v2161_v62 }
 0x71e   :  { %3378 = vmatpush3.bf16.msra.mxu1 %v3679_v13  ;;  %3385 = vmatprep.mubr.msk.bf16.mxu1 %vm3691_vm0, %v3690_v0 }
 0x71f   :  { %3297 = vmatpush3.bf16.msra.mxu0 %v3680_v33  ;;  %3379 = vmatprep.subr.bf16.mxu1 %v3690_v0 }
 0x722   :  { %2872 = vmatmul.mubr.bf16.vlgmr.msra.gmra.mxu0 %v2163_v56  ;;  %3380 = vmatpush3.bf16.msra.mxu1 %v3681_v55 }
 0x723   :  { %3381 = vmatprep.subr.bf16.mxu1 %v3690_v0 }
 0x726   :  { %3382 = vmatpush3.bf16.msra.mxu1 %v3682_v57 }
 0x727   :  { %3383 = vmatprep.subr.bf16.mxu1 %v3690_v0 }
 0x72a   :  { %3384 = vmatpush3.bf16.msra.mxu1 %v3683_v35 }
 0x72d   :  { %3386 = vmatmul.mubr.msk.bf16.vlgmr.msra.gmra.mxu1 %vm62_vm1, %v2167_v36 }
 0x7bd   :  { %v3232_v59 = vpop.f32.mrf.mxu1 }
 0x7bf   :  { %v3233_v1 = vpop.f32.mrf.mxu1 }
 0x7c0   :  { %v3234_v28 = vadd.f32 %v3233_v1, %v3232_v59 }
 0x7c1   :  { %v3235_v2 = vpop.f32.mrf.mxu1 }
 0x7c2   :  { %v3254_v39 = vpop.f32.mrf.mxu0  ;;  %v2754_v52 = vadd.f32 %v3234_v28, %v3030_v10 }
 0x7c3   :  { %v3236_v4 = vpop.f32.mrf.mxu1 }
 0x7c4   :  { %v3255_v21 = vpop.f32.mrf.mxu0 }
 0x7c5   :  { %v3256_v15 = vadd.f32 %v3255_v21, %v3254_v39 }
 0x7c6   :  { %v3257_v38 = vpop.f32.mrf.mxu0 }
 0x7c7   :  { %v2794_v20 = vadd.f32 %v3256_v15, %v2754_v52 }
 0x7c8   :  { %v3258_v5 = vpop.f32.mrf.mxu0 }
 0x7dd   :  { %v3276_v6 = vpop.f32.mrf.mxu1 }
 0x7df   :  { %v3277_v9 = vpop.f32.mrf.mxu1 }
 0x7e0   :  { %v3278_v42 = vadd.f32 %v3277_v9, %v3276_v6 }
 0x7e1   :  { %v3279_v0 = vpop.f32.mrf.mxu1 }
 0x7e2   :  { %v3298_v14 = vpop.f32.mrf.mxu0  ;;  %v2834_v17 = vadd.f32 %v3278_v42, %v2794_v20 }
 0x7e3   :  { %v3280_v7 = vpop.f32.mrf.mxu1 }
 0x7e4   :  { %v3299_v48 = vpop.f32.mrf.mxu0 }
 0x7e5   :  { %v3300_v24 = vadd.f32 %v3299_v48, %v3298_v14 }
 0x7e6   :  { %v3301_v41 = vpop.f32.mrf.mxu0 }
 0x7e7   :  { %v2874_v8 = vadd.f32 %v3300_v24, %v2834_v17 }
 0x7e8   :  { %v3302_v25 = vpop.f32.mrf.mxu0 }
 0x7ed   :  { %v2913_v30 = vpop.f32.mrf.mxu1 }
 0x7ee   :  { %v2914_v37 = vadd.f32 %v2913_v30, %v2874_v8 }
 0x7ef   :  { %v3387_v60 = vpop.f32.mrf.mxu1 }
 0x7f0   :  { %v2919_v12 = vmul.f32 %v2914_v37, %v3807_v32 }
 0x7f1   :  { %v2916_v16 = vpop.f32.mrf.mxu1 }
 0x7f2   :  { %v2921_v31 = vsel %vm2920_vm5, %v2919_v12, 0.0 }
 0x7f3   :  { %v3388_v27 = vpop.f32.mrf.mxu1  ;;  %2922 = vadd.xlane.f32.xlu0 %v2921_v31 }
 0x87c   :  { %v2923_v26 = vpop.xlane.xlu0 %2922 }
 0x87d   :  { %2925 = vst.msk [vmem:[%s4710_s5] sm:$0x3] %vm2924_vm6, %v2923_v26 }

</bundles_post_ra>
